<compile_context>
chip_gen: v6e
topology: v6e:2x2x1
jax: 0.10.0
libtpu: 0.0.40
codegen_flags: <defaults>
</compile_context>

<pallas_src>
import functools

import jax
import jax.numpy as jnp
import numpy as np
from jax import lax
from jax.experimental import pallas as pl
from jax.experimental.pallas import tpu as pltpu

EPS = 1e-5
_VMEM_LIMIT = 48 * 1024 * 1024   # safe on v5e/v6e (128 MiB) and v7x (64 MiB)


# --------------------------------------------------------------------------
# Kernel 1/2: 3x3 conv (optionally fused with BN-affine + ReLU of the input)
#             + fused single-pass BN statistics of the conv output.
# --------------------------------------------------------------------------
def _conv3x3_kernel(x_ref, w_ref, scale_ref, shift_ref, y_ref, stats_ref,
                    pad_ref, *, H, W, C, apply_act):
    """One grid step = one image: y = conv3x3(act(x)); stats += [sum, sumsq]."""
    n = pl.program_id(0)

    @pl.when(n == 0)
    def _init():
        # Zero the halo ring and the stats accumulator exactly once; the
        # interior of pad_ref is rewritten every step, the ring stays zero.
        pad_ref[...] = jnp.zeros_like(pad_ref)
        stats_ref[...] = jnp.zeros_like(stats_ref)

    x = x_ref[0]                                          # [H, W, C] f32
    if apply_act:                                         # fused BN(prev)+ReLU
        x = jnp.maximum(x * scale_ref[...] + shift_ref[...], 0.0)
    pad_ref[1:H + 1, 1:W + 1, :] = x                      # interior only

    # im2col: one fat K = 9*C matmul instead of 9 skinny K = C matmuls.
    taps = [pad_ref[kh:kh + H, kw:kw + W, :]
            for kh in range(3) for kw in range(3)]
    patch = jnp.concatenate(taps, axis=-1).reshape(H * W, 9 * C)
    acc = jnp.dot(patch.astype(w_ref.dtype), w_ref[...],
                  preferred_element_type=jnp.float32)     # [H*W, C] f32

    # Single-pass BN statistics, accumulated across the sequential grid axis.
    stats_ref[...] += jnp.concatenate(
        [jnp.sum(acc, axis=0, keepdims=True),
         jnp.sum(acc * acc, axis=0, keepdims=True)], axis=0)

    y_ref[0] = acc.reshape(H, W, C)


def _conv3x3_block(x_nhwc, w_mat, scale, shift, *, apply_act):
    """y = conv3x3(act(x_nhwc)) and per-channel [sum, sumsq] of y."""
    N, H, W, C = x_nhwc.shape
    kernel = functools.partial(_conv3x3_kernel, H=H, W=W, C=C,
                               apply_act=apply_act)
    # TODO(synk): for large H*W additionally tile over H row-bands with a
    # 1-row halo, and use a pure-VPU broadcast-MAC conv for very small C.
    return pl.pallas_call(
        kernel,
        grid=(N,),
        in_specs=[
            pl.BlockSpec((1, H, W, C), lambda n: (n, 0, 0, 0)),   # activation
            pl.BlockSpec((9 * C, C), lambda n: (0, 0)),           # weights (resident)
            pl.BlockSpec((1, C), lambda n: (0, 0)),               # bn scale
            pl.BlockSpec((1, C), lambda n: (0, 0)),               # bn shift
        ],
        out_specs=(
            pl.BlockSpec((1, H, W, C), lambda n: (n, 0, 0, 0)),   # conv output
            pl.BlockSpec((2, C), lambda n: (0, 0)),               # stats accumulator
        ),
        out_shape=(
            jax.ShapeDtypeStruct((N, H, W, C), jnp.float32),
            jax.ShapeDtypeStruct((2, C), jnp.float32),
        ),
        scratch_shapes=[pltpu.VMEM((H + 2, W + 2, C), jnp.float32)],
        compiler_params=pltpu.CompilerParams(
            # Grid axis is a reduction axis for the BN-stats accumulator.
            dimension_semantics=("arbitrary",),
            vmem_limit_bytes=_VMEM_LIMIT),
    )(x_nhwc, w_mat, scale, shift)


# --------------------------------------------------------------------------
# Kernel 3: bn2 affine + residual add + ReLU on a lane-dense [N*H, W*C] view.
# --------------------------------------------------------------------------
def _bn_add_relu_kernel(y_ref, x_ref, scale_ref, shift_ref, o_ref):
    o_ref[...] = jnp.maximum(
        y_ref[...] * scale_ref[...] + shift_ref[...] + x_ref[...], 0.0)


def _bn_add_relu(y2d, x2d, scale_row, shift_row):
    R, L = y2d.shape
    row_tile = 256 if (R % 256 == 0) else R
    return pl.pallas_call(
        _bn_add_relu_kernel,
        grid=(R // row_tile,),
        in_specs=[
            pl.BlockSpec((row_tile, L), lambda i: (i, 0)),
            pl.BlockSpec((row_tile, L), lambda i: (i, 0)),
            pl.BlockSpec((1, L), lambda i: (0, 0)),
            pl.BlockSpec((1, L), lambda i: (0, 0)),
        ],
        out_specs=pl.BlockSpec((row_tile, L), lambda i: (i, 0)),
        out_shape=jax.ShapeDtypeStruct((R, L), jnp.float32),
        compiler_params=pltpu.CompilerParams(
            dimension_semantics=("parallel",),
            vmem_limit_bytes=_VMEM_LIMIT),
    )(y2d, x2d, scale_row, shift_row)


# --------------------------------------------------------------------------
# Wrapper
# --------------------------------------------------------------------------
def _fold_bn(stats, gamma, beta, count, eps):
    """Fold training-mode BN into per-channel scale/shift from [sum, sumsq]."""
    mean = stats[0] / count
    var = jnp.maximum(stats[1] / count - mean * mean, 0.0)
    scale = gamma * lax.rsqrt(var + eps)
    shift = beta - mean * scale
    return scale, shift


def basic_block(x_nchw, w1, g1, b1, w2, g2, b2, *,
                mxu_dtype=jnp.bfloat16, eps=EPS):
    """x_nchw: [N, C, H, W] f32.  Conv weights w1/w2 in HWIO: [3, 3, Cin, Cout]."""
    N, C, H, W = x_nchw.shape
    x_nhwc = jnp.transpose(x_nchw, (0, 2, 3, 1)).astype(jnp.float32)

    # HWIO -> im2col layout [9*Cin, Cout] once, in the MXU operand dtype.
    w1_mat = w1.reshape(9 * C, C).astype(mxu_dtype)
    w2_mat = w2.reshape(9 * C, C).astype(mxu_dtype)

    ones = jnp.ones((1, C), jnp.float32)
    zeros = jnp.zeros((1, C), jnp.float32)
    count = N * H * W

    # conv1 (+ fused BN1 statistics across the whole batch).
    y1, stats1 = _conv3x3_block(x_nhwc, w1_mat, ones, zeros, apply_act=False)
    scale1, shift1 = _fold_bn(stats1, g1, b1, count, eps)

    # BN1 + ReLU fused into conv2 (+ fused BN2 statistics).
    y2, stats2 = _conv3x3_block(y1, w2_mat, scale1.reshape(1, C),
                                shift1.reshape(1, C), apply_act=True)
    scale2, shift2 = _fold_bn(stats2, g2, b2, count, eps)

    # BN2 + residual add + ReLU on a lane-dense [N*H, W*C] view.
    L = W * C
    out2d = _bn_add_relu(
        y2.reshape(N * H, L), x_nhwc.reshape(N * H, L),
        jnp.tile(scale2, W).reshape(1, L), jnp.tile(shift2, W).reshape(1, L))
    return jnp.transpose(out2d.reshape(N, H, W, C), (0, 3, 1, 2))


# --------------------------------------------------------------------------
# Plain-JAX reference (NCHW activations, HWIO weights).
# --------------------------------------------------------------------------
def basic_block_ref(x_nchw, w1, g1, b1, w2, g2, b2, *,
                    conv_dtype=jnp.float32, eps=EPS):
    prec = lax.Precision.HIGHEST if conv_dtype == jnp.float32 else None

    def conv(x, w):
        return lax.conv_general_dilated(
            x.astype(conv_dtype), w.astype(conv_dtype),
            window_strides=(1, 1), padding=((1, 1), (1, 1)),
            dimension_numbers=("NCHW", "HWIO", "NCHW"),
            preferred_element_type=jnp.float32, precision=prec)

    def bn(y, g, b):
        mean = jnp.mean(y, axis=(0, 2, 3), keepdims=True)
        var = jnp.mean((y - mean) ** 2, axis=(0, 2, 3), keepdims=True)
        return ((y - mean) * lax.rsqrt(var + eps) * g.reshape(1, -1, 1, 1)
                + b.reshape(1, -1, 1, 1))

    h = jnp.maximum(bn(conv(x_nchw, w1), g1, b1), 0.0)
    h = bn(conv(h, w2), g2, b2)
    return jnp.maximum(h + x_nchw, 0.0)


if __name__ == "__main__":
    # Small shapes: batch=2, channels=4 (in_planes == planes), spatial=16.
    N, C, H, W = 2, 4, 16, 16
    key = jax.random.PRNGKey(0)
    kx, kw1, kw2, kg1, kb1, kg2, kb2 = jax.random.split(key, 7)

    x = jax.random.normal(kx, (N, C, H, W), jnp.float32)
    w1 = 0.1 * jax.random.normal(kw1, (3, 3, C, C), jnp.float32)   # HWIO
    w2 = 0.1 * jax.random.normal(kw2, (3, 3, C, C), jnp.float32)
    g1 = 1.0 + 0.1 * jax.random.normal(kg1, (C,), jnp.float32)
    b1 = 0.1 * jax.random.normal(kb1, (C,), jnp.float32)
    g2 = 1.0 + 0.1 * jax.random.normal(kg2, (C,), jnp.float32)
    b2 = 0.1 * jax.random.normal(kb2, (C,), jnp.float32)

    # f32 MXU operands vs f32 reference (tight tolerance).
    out_f32 = jax.block_until_ready(
        basic_block(x, w1, g1, b1, w2, g2, b2, mxu_dtype=jnp.float32))
    ref_f32 = jax.block_until_ready(basic_block_ref(x, w1, g1, b1, w2, g2, b2))
    np.testing.assert_allclose(np.asarray(out_f32), np.asarray(ref_f32),
                               rtol=1e-3, atol=1e-3)

    # Default bf16 MXU operands (f32 accumulation): compare against a matching
    # bf16-conv reference, plus a loose sanity check vs the pure-f32 reference.
    out_bf16 = jax.block_until_ready(basic_block(x, w1, g1, b1, w2, g2, b2))
    ref_bf16 = jax.block_until_ready(
        basic_block_ref(x, w1, g1, b1, w2, g2, b2, conv_dtype=jnp.bfloat16))
    np.testing.assert_allclose(np.asarray(out_bf16), np.asarray(ref_bf16),
                               rtol=1e-2, atol=1e-2)
    np.testing.assert_allclose(np.asarray(out_bf16), np.asarray(ref_f32),
                               rtol=5e-2, atol=5e-2)

    print("KERNEL_OK")
</pallas_src>

<mosaic_0001>
module attributes {stable_mosaic.version = 11 : i64} {
  func.func @_conv3x3_kernel(%arg0: i32, %arg1: memref<1x16x16x4xf32, #tpu.memory_space<vmem>>, %arg2: memref<36x4xf32, #tpu.memory_space<vmem>>, %arg3: memref<1x4xf32, #tpu.memory_space<vmem>>, %arg4: memref<1x4xf32, #tpu.memory_space<vmem>>, %arg5: memref<1x16x16x4xf32, #tpu.memory_space<vmem>>, %arg6: memref<2x4xf32, #tpu.memory_space<vmem>>, %arg7: memref<18x18x4xf32, #tpu.memory_space<vmem>>) attributes {dimension_semantics = [#tpu.dimension_semantics<arbitrary>], iteration_bounds = array<i64: 2>, scalar_prefetch = 0 : i64, scratch_operands = 1 : i64, tpu.core_type = #tpu.core_type<tc>, window_params = [{transform_indices = @transform_0, window_bounds = array<i64: 1, 16, 16, 4>}, {pipeline_mode = #tpu.pipeline_mode<synchronous>, transform_indices = @transform_1, window_bounds = array<i64: 36, 4>}, {pipeline_mode = #tpu.pipeline_mode<synchronous>, transform_indices = @transform_2, window_bounds = array<i64: 1, 4>}, {pipeline_mode = #tpu.pipeline_mode<synchronous>, transform_indices = @transform_3, window_bounds = array<i64: 1, 4>}, {transform_indices = @transform_4, window_bounds = array<i64: 1, 16, 16, 4>}, {pipeline_mode = #tpu.pipeline_mode<synchronous>, transform_indices = @transform_5, window_bounds = array<i64: 2, 4>}]} {
    %c0_i32 = arith.constant 0 : i32
    %0 = arith.cmpi eq, %arg0, %c0_i32 : i32
    %1 = arith.extui %0 : i1 to i32
    %c0_i32_0 = arith.constant 0 : i32
    %2 = arith.cmpi ne, %1, %c0_i32_0 : i32
    scf.if %2 {
      %cst_44 = arith.constant 0.000000e+00 : f32
      %32 = vector.broadcast %cst_44 : f32 to vector<18x18x4xf32>
      %c0_45 = arith.constant 0 : index
      %c0_46 = arith.constant 0 : index
      %c0_47 = arith.constant 0 : index
      %33 = vector.load %arg7[%c0_45, %c0_46, %c0_47] : memref<18x18x4xf32, #tpu.memory_space<vmem>>, vector<18x18x4xf32>
      tpu.vector_store %arg7[%c0_45, %c0_46, %c0_47], %32 {strides = array<i32>} : memref<18x18x4xf32, #tpu.memory_space<vmem>>, vector<18x18x4xf32>,
      %cst_48 = arith.constant 0.000000e+00 : f32
      %34 = vector.broadcast %cst_48 : f32 to vector<2x4xf32>
      %c0_49 = arith.constant 0 : index
      %c0_50 = arith.constant 0 : index
      %35 = vector.load %arg6[%c0_49, %c0_50] : memref<2x4xf32, #tpu.memory_space<vmem>>, vector<2x4xf32>
      tpu.vector_store %arg6[%c0_49, %c0_50], %34 {strides = array<i32>} : memref<2x4xf32, #tpu.memory_space<vmem>>, vector<2x4xf32>,
    } else {
    }
    %c0 = arith.constant 0 : index
    %c0_1 = arith.constant 0 : index
    %c0_2 = arith.constant 0 : index
    %c0_3 = arith.constant 0 : index
    %3 = vector.load %arg1[%c0, %c0_1, %c0_2, %c0_3] : memref<1x16x16x4xf32, #tpu.memory_space<vmem>>, vector<1x16x16x4xf32>
    %4 = vector.shape_cast %3 : vector<1x16x16x4xf32> to vector<16x16x4xf32>
    %c1 = arith.constant 1 : index
    %c1_4 = arith.constant 1 : index
    %c0_5 = arith.constant 0 : index
    %5 = vector.load %arg7[%c1, %c1_4, %c0_5] : memref<18x18x4xf32, #tpu.memory_space<vmem>>, vector<16x16x4xf32>
    tpu.vector_store %arg7[%c1, %c1_4, %c0_5], %4 {strides = array<i32>} : memref<18x18x4xf32, #tpu.memory_space<vmem>>, vector<16x16x4xf32>,
    %c0_6 = arith.constant 0 : index
    %c0_7 = arith.constant 0 : index
    %c0_8 = arith.constant 0 : index
    %6 = vector.load %arg7[%c0_6, %c0_7, %c0_8] : memref<18x18x4xf32, #tpu.memory_space<vmem>>, vector<16x16x4xf32>
    %c0_9 = arith.constant 0 : index
    %c1_10 = arith.constant 1 : index
    %c0_11 = arith.constant 0 : index
    %7 = vector.load %arg7[%c0_9, %c1_10, %c0_11] : memref<18x18x4xf32, #tpu.memory_space<vmem>>, vector<16x16x4xf32>
    %c0_12 = arith.constant 0 : index
    %c2 = arith.constant 2 : index
    %c0_13 = arith.constant 0 : index
    %8 = vector.load %arg7[%c0_12, %c2, %c0_13] : memref<18x18x4xf32, #tpu.memory_space<vmem>>, vector<16x16x4xf32>
    %c1_14 = arith.constant 1 : index
    %c0_15 = arith.constant 0 : index
    %c0_16 = arith.constant 0 : index
    %9 = vector.load %arg7[%c1_14, %c0_15, %c0_16] : memref<18x18x4xf32, #tpu.memory_space<vmem>>, vector<16x16x4xf32>
    %c1_17 = arith.constant 1 : index
    %c1_18 = arith.constant 1 : index
    %c0_19 = arith.constant 0 : index
    %10 = vector.load %arg7[%c1_17, %c1_18, %c0_19] : memref<18x18x4xf32, #tpu.memory_space<vmem>>, vector<16x16x4xf32>
    %c1_20 = arith.constant 1 : index
    %c2_21 = arith.constant 2 : index
    %c0_22 = arith.constant 0 : index
    %11 = vector.load %arg7[%c1_20, %c2_21, %c0_22] : memref<18x18x4xf32, #tpu.memory_space<vmem>>, vector<16x16x4xf32>
    %c2_23 = arith.constant 2 : index
    %c0_24 = arith.constant 0 : index
    %c0_25 = arith.constant 0 : index
    %12 = vector.load %arg7[%c2_23, %c0_24, %c0_25] : memref<18x18x4xf32, #tpu.memory_space<vmem>>, vector<16x16x4xf32>
    %c2_26 = arith.constant 2 : index
    %c1_27 = arith.constant 1 : index
    %c0_28 = arith.constant 0 : index
    %13 = vector.load %arg7[%c2_26, %c1_27, %c0_28] : memref<18x18x4xf32, #tpu.memory_space<vmem>>, vector<16x16x4xf32>
    %c2_29 = arith.constant 2 : index
    %c2_30 = arith.constant 2 : index
    %c0_31 = arith.constant 0 : index
    %14 = vector.load %arg7[%c2_29, %c2_30, %c0_31] : memref<18x18x4xf32, #tpu.memory_space<vmem>>, vector<16x16x4xf32>
    %15 = tpu.concatenate %6, %7, %8, %9, %10, %11, %12, %13, %14 in 2 : vector<16x16x4xf32>, vector<16x16x4xf32>, vector<16x16x4xf32>, vector<16x16x4xf32>, vector<16x16x4xf32>, vector<16x16x4xf32>, vector<16x16x4xf32>, vector<16x16x4xf32>, vector<16x16x4xf32> -> vector<16x16x36xf32>
    %16 = vector.shape_cast %15 : vector<16x16x36xf32> to vector<256x36xf32>
    %c0_32 = arith.constant 0 : index
    %c0_33 = arith.constant 0 : index
    %17 = vector.load %arg2[%c0_32, %c0_33] : memref<36x4xf32, #tpu.memory_space<vmem>>, vector<36x4xf32>
    %cst = arith.constant dense<0.000000e+00> : vector<256x4xf32>
    %18 = tpu.matmul %16, %17, %cst {dimension_numbers = #tpu.dot_dimension_numbers<[1], [0], [0], [1], [0, 0, 1, 1], [], []>} : vector<256x36xf32>, vector<36x4xf32>, vector<256x4xf32> -> vector<256x4xf32>
    %c0_34 = arith.constant 0 : index
    %c0_35 = arith.constant 0 : index
    %19 = vector.load %arg6[%c0_34, %c0_35] : memref<2x4xf32, #tpu.memory_space<vmem>>, vector<2x4xf32>
    %cst_36 = arith.constant dense<0.000000e+00> : vector<4xf32>
    %20 = vector.multi_reduction <add>, %18, %cst_36 [0] : vector<256x4xf32> to vector<4xf32>
    %21 = vector.shape_cast %20 : vector<4xf32> to vector<1x4xf32>
    %22 = arith.mulf %18, %18 : vector<256x4xf32>
    %cst_37 = arith.constant dense<0.000000e+00> : vector<4xf32>
    %23 = vector.multi_reduction <add>, %22, %cst_37 [0] : vector<256x4xf32> to vector<4xf32>
    %24 = vector.shape_cast %23 : vector<4xf32> to vector<1x4xf32>
    %25 = tpu.concatenate %21, %24 in 0 : vector<1x4xf32>, vector<1x4xf32> -> vector<2x4xf32>
    %26 = arith.addf %19, %25 : vector<2x4xf32>
    %c0_38 = arith.constant 0 : index
    %c0_39 = arith.constant 0 : index
    %27 = vector.load %arg6[%c0_38, %c0_39] : memref<2x4xf32, #tpu.memory_space<vmem>>, vector<2x4xf32>
    tpu.vector_store %arg6[%c0_38, %c0_39], %26 {strides = array<i32>} : memref<2x4xf32, #tpu.memory_space<vmem>>, vector<2x4xf32>,
    %28 = vector.shape_cast %18 : vector<256x4xf32> to vector<16x16x4xf32>
    %c0_40 = arith.constant 0 : index
    %c0_41 = arith.constant 0 : index
    %c0_42 = arith.constant 0 : index
    %c0_43 = arith.constant 0 : index
    %29 = vector.load %arg5[%c0_40, %c0_41, %c0_42, %c0_43] : memref<1x16x16x4xf32, #tpu.memory_space<vmem>>, vector<1x16x16x4xf32>
    %30 = vector.shape_cast %29 : vector<1x16x16x4xf32> to vector<16x16x4xf32>
    %31 = vector.shape_cast %28 : vector<16x16x4xf32> to vector<1x16x16x4xf32>
    tpu.vector_store %arg5[%c0_40, %c0_41, %c0_42, %c0_43], %31 {strides = array<i32>} : memref<1x16x16x4xf32, #tpu.memory_space<vmem>>, vector<1x16x16x4xf32>,
    return
  }
  func.func @transform_0(%arg0: i32) -> (i32, i32, i32, i32) {
    %c0_i32 = arith.constant 0 : i32
    %c0_i32_0 = arith.constant 0 : i32
    %c0_i32_1 = arith.constant 0 : i32
    %c0_i32_2 = arith.constant 0 : i32
    return %arg0, %c0_i32, %c0_i32_0, %c0_i32_1 : i32, i32, i32, i32
  }
  func.func @transform_1(%arg0: i32) -> (i32, i32) {
    %c0_i32 = arith.constant 0 : i32
    %c0_i32_0 = arith.constant 0 : i32
    %c0_i32_1 = arith.constant 0 : i32
    return %c0_i32, %c0_i32_0 : i32, i32
  }
  func.func @transform_2(%arg0: i32) -> (i32, i32) {
    %c0_i32 = arith.constant 0 : i32
    %c0_i32_0 = arith.constant 0 : i32
    %c0_i32_1 = arith.constant 0 : i32
    return %c0_i32, %c0_i32_0 : i32, i32
  }
  func.func @transform_3(%arg0: i32) -> (i32, i32) {
    %c0_i32 = arith.constant 0 : i32
    %c0_i32_0 = arith.constant 0 : i32
    %c0_i32_1 = arith.constant 0 : i32
    return %c0_i32, %c0_i32_0 : i32, i32
  }
  func.func @transform_4(%arg0: i32) -> (i32, i32, i32, i32) {
    %c0_i32 = arith.constant 0 : i32
    %c0_i32_0 = arith.constant 0 : i32
    %c0_i32_1 = arith.constant 0 : i32
    %c0_i32_2 = arith.constant 0 : i32
    return %arg0, %c0_i32, %c0_i32_0, %c0_i32_1 : i32, i32, i32, i32
  }
  func.func @transform_5(%arg0: i32) -> (i32, i32) {
    %c0_i32 = arith.constant 0 : i32
    %c0_i32_0 = arith.constant 0 : i32
    %c0_i32_1 = arith.constant 0 : i32
    return %c0_i32, %c0_i32_0 : i32, i32
  }
}

</mosaic_0001>

<bundles_post_ra>
// kernel: tpu_custom_call.1
= control target key start
LH: loop header
LB: loop body
LE: loop exit
PB: predicated region body
PF: predicated region fallthrough
CT: control target
= control target key end

     0   :  { %11 = vsyncpa [#allocation4], 0  ;;  %s2806_s18 = smov 0   ;;  %s4198_s0 = inlined_call_operand.vmem [shape: f32[2,16,16,4], index: 0, kind: input, shape index: {}]   ;;  %s4199_s1 = inlined_call_operand.vmem [shape: f32[36,4], index: 1, kind: input, shape index: {}]   ;;  %s4200_s2 = inlined_call_operand.vmem [shape: f32[1,4], index: 2, kind: input, shape index: {}]   ;;  %s4201_s3 = inlined_call_operand.vmem [shape: f32[1,4], index: 3, kind: input, shape index: {}]   ;;  %s4202_s4 = inlined_call_operand.vmem [shape: f32[2,16,16,4], index: 4, kind: output, shape index: {0}]   ;;  %s4203_s5 = inlined_call_operand.hbm [shape: f32[2,4], index: 5, kind: output, shape index: {1}]  }
   0x1 LB: > { %s2812_s2 = sadd.s32 4294967295, %s2764_s18   ;;  %p2549_p0 = scmp.ge.s32.totalorder %s2764_s18, 1  ;;  %s2764_s18 = sphi %s2806_s18, %s17_s18  }
   0x2   : > { %p186_p1 = scmp.lt.s32.totalorder %s2764_s18, 3 }
   0x4   : > { %p187_p2 = pnand %p2549_p0, %p186_p1 }
   0x6   : > { %190 = sbr.rel (%p187_p2) target bundleno = 907 (0x38b), region = 36 }
   0xb   : > { %p214_p3 = scmp.lt.s32.totalorder %s2812_s2, 1  ;;  %p2554_p4 = scmp.ne.s32.totalorder %s2812_s2, 0 }
   0xd   : > { %s215_s3 = scalar_select %p214_p3, %s2812_s2, 1 }
   0xe   : > { %227 = sbr.rel (%p2554_p4) target bundleno = 48 (0x30), region = 40 }
   0xf   : > { %s2592_s19 = sshll.u32 %s215_s3, 8 }
  0x10   : > { %s2821_s22 = scalar_lea.vmem %s4198_s0, %s2592_s19  ;;  %s2826_s25 = scalar_lea.vmem %s4202_s4, %s2592_s19 }
  0x13   : > { %vm228_vm0 = vcmask 31744   ;;  %vm231_vm1 = vcmask 25600   ;;  %v2766_v0 = vmov 0.0  }
  0x14   : > { %229 = vst.msk [vmem:[#allocation2] sm:$0xff] %vm228_vm0, %v2766_v0  ;;  %230 = vst.msk [vmem:[#allocation2 + $0x8] sm:$0xff] %vm228_vm0, %v2766_v0 }
  0x15   : > { %233 = vst.msk [vmem:[#allocation2 + $0x18] sm:$0xff] %vm228_vm0, %v2766_v0  ;;  %234 = vst.msk [vmem:[#allocation2 + $0x20] sm:$0xff] %vm228_vm0, %v2766_v0 }
  0x16   : > { %236 = vst.msk [vmem:[#allocation2 + $0x30] sm:$0xff] %vm228_vm0, %v2766_v0  ;;  %237 = vst.msk [vmem:[#allocation2 + $0x38] sm:$0xff] %vm228_vm0, %v2766_v0 }
  0x17   : > { %239 = vst.msk [vmem:[#allocation2 + $0x48] sm:$0xff] %vm228_vm0, %v2766_v0  ;;  %240 = vst.msk [vmem:[#allocation2 + $0x50] sm:$0xff] %vm228_vm0, %v2766_v0 }
  0x18   : > { %242 = vst.msk [vmem:[#allocation2 + $0x60] sm:$0xff] %vm228_vm0, %v2766_v0  ;;  %243 = vst.msk [vmem:[#allocation2 + $0x68] sm:$0xff] %vm228_vm0, %v2766_v0 }
  0x19   : > { %245 = vst.msk [vmem:[#allocation2 + $0x78] sm:$0xff] %vm228_vm0, %v2766_v0  ;;  %246 = vst.msk [vmem:[#allocation2 + $0x80] sm:$0xff] %vm228_vm0, %v2766_v0 }
  0x1a   : > { %248 = vst.msk [vmem:[#allocation2 + $0x90] sm:$0xff] %vm228_vm0, %v2766_v0  ;;  %249 = vst.msk [vmem:[#allocation2 + $0x98] sm:$0xff] %vm228_vm0, %v2766_v0 }
  0x1b   : > { %251 = vst.msk [vmem:[#allocation2 + $0xa8] sm:$0xff] %vm228_vm0, %v2766_v0  ;;  %252 = vst.msk [vmem:[#allocation2 + $0xb0] sm:$0xff] %vm228_vm0, %v2766_v0 }
  0x1c   : > { %254 = vst.msk [vmem:[#allocation2 + $0xc0] sm:$0xff] %vm228_vm0, %v2766_v0  ;;  %255 = vst.msk [vmem:[#allocation2 + $0xc8] sm:$0xff] %vm228_vm0, %v2766_v0 }
  0x1d   : > { %257 = vst.msk [vmem:[#allocation2 + $0xd8] sm:$0xff] %vm228_vm0, %v2766_v0  ;;  %258 = vst.msk [vmem:[#allocation2 + $0xe0] sm:$0xff] %vm228_vm0, %v2766_v0 }
  0x1e   : > { %260 = vst.msk [vmem:[#allocation2 + $0xf0] sm:$0xff] %vm228_vm0, %v2766_v0  ;;  %261 = vst.msk [vmem:[#allocation2 + $0xf8] sm:$0xff] %vm228_vm0, %v2766_v0 }
  0x1f   : > { %263 = vst.msk [vmem:[#allocation2 + $0x108] sm:$0xff] %vm228_vm0, %v2766_v0  ;;  %264 = vst.msk [vmem:[#allocation2 + $0x110] sm:$0xff] %vm228_vm0, %v2766_v0 }
  0x20   : > { %266 = vst.msk [vmem:[#allocation2 + $0x120] sm:$0xff] %vm228_vm0, %v2766_v0  ;;  %267 = vst.msk [vmem:[#allocation2 + $0x128] sm:$0xff] %vm228_vm0, %v2766_v0 }
  0x21   : > { %269 = vst.msk [vmem:[#allocation2 + $0x138] sm:$0xff] %vm228_vm0, %v2766_v0  ;;  %270 = vst.msk [vmem:[#allocation2 + $0x140] sm:$0xff] %vm228_vm0, %v2766_v0 }
  0x22   : > { %272 = vst.msk [vmem:[#allocation2 + $0x150] sm:$0xff] %vm228_vm0, %v2766_v0  ;;  %273 = vst.msk [vmem:[#allocation2 + $0x158] sm:$0xff] %vm228_vm0, %v2766_v0 }
  0x23   : > { %275 = vst.msk [vmem:[#allocation2 + $0x168] sm:$0xff] %vm228_vm0, %v2766_v0  ;;  %276 = vst.msk [vmem:[#allocation2 + $0x170] sm:$0xff] %vm228_vm0, %v2766_v0 }
  0x24   : > { %278 = vst.msk [vmem:[#allocation2 + $0x180] sm:$0xff] %vm228_vm0, %v2766_v0  ;;  %279 = vst.msk [vmem:[#allocation2 + $0x188] sm:$0xff] %vm228_vm0, %v2766_v0 }
  0x25   : > { %281 = vst.msk [vmem:[#allocation2 + $0x198] sm:$0xff] %vm228_vm0, %v2766_v0  ;;  %282 = vst.msk [vmem:[#allocation2 + $0x1a0] sm:$0xff] %vm228_vm0, %v2766_v0 }
  0x26   : > { %232 = vst.msk [vmem:[#allocation2 + $0x10] sm:$0x3] %vm231_vm1, %v2766_v0  ;;  %235 = vst.msk [vmem:[#allocation2 + $0x28] sm:$0x3] %vm231_vm1, %v2766_v0 }
  0x27   : > { %238 = vst.msk [vmem:[#allocation2 + $0x40] sm:$0x3] %vm231_vm1, %v2766_v0  ;;  %241 = vst.msk [vmem:[#allocation2 + $0x58] sm:$0x3] %vm231_vm1, %v2766_v0 }
  0x28   : > { %244 = vst.msk [vmem:[#allocation2 + $0x70] sm:$0x3] %vm231_vm1, %v2766_v0  ;;  %247 = vst.msk [vmem:[#allocation2 + $0x88] sm:$0x3] %vm231_vm1, %v2766_v0 }
  0x29   : > { %250 = vst.msk [vmem:[#allocation2 + $0xa0] sm:$0x3] %vm231_vm1, %v2766_v0  ;;  %253 = vst.msk [vmem:[#allocation2 + $0xb8] sm:$0x3] %vm231_vm1, %v2766_v0 }
  0x2a   : > { %256 = vst.msk [vmem:[#allocation2 + $0xd0] sm:$0x3] %vm231_vm1, %v2766_v0  ;;  %259 = vst.msk [vmem:[#allocation2 + $0xe8] sm:$0x3] %vm231_vm1, %v2766_v0 }
  0x2b   : > { %262 = vst.msk [vmem:[#allocation2 + $0x100] sm:$0x3] %vm231_vm1, %v2766_v0  ;;  %265 = vst.msk [vmem:[#allocation2 + $0x118] sm:$0x3] %vm231_vm1, %v2766_v0 }
  0x2c   : > { %268 = vst.msk [vmem:[#allocation2 + $0x130] sm:$0x3] %vm231_vm1, %v2766_v0  ;;  %271 = vst.msk [vmem:[#allocation2 + $0x148] sm:$0x3] %vm231_vm1, %v2766_v0 }
  0x2d   : > { %274 = vst.msk [vmem:[#allocation2 + $0x160] sm:$0x3] %vm231_vm1, %v2766_v0  ;;  %277 = vst.msk [vmem:[#allocation2 + $0x178] sm:$0x3] %vm231_vm1, %v2766_v0 }
  0x2e   : > { %280 = vst.msk [vmem:[#allocation2 + $0x190] sm:$0x3] %vm231_vm1, %v2766_v0  ;;  %283 = vst.msk [vmem:[#allocation2 + $0x1a8] sm:$0x3] %vm231_vm1, %v2766_v0 }
  0x2f   : > { %284 = vst.msk [vmem:[#allocation3] sm:$0x3] %vm231_vm1, %v2766_v0 }
  0x30 PF: > { %v383_v1 = vld [vmem:[#allocation2 + $0x1] sm:$0xff]  ;;  %v384_v2 = vld [vmem:[#allocation2 + $0x9] sm:$0xff]  ;;  %vm318_vm2 = vcmask 31744   ;;  %s2767_s26 = smov 4   ;;  %v288_v8 = vld [vmem:[%s2821_s22 + $0x18] sm:$0xff]  ;;  %s2768_s27 = smov 8  }
  0x31   : > { %v287_v3 = vld [vmem:[%s2821_s22 + $0x10] sm:$0xff]  ;;  %672 = vrot.lane.b32.xlu0 %v383_v1, %s2767_s26  ;;  %v285_v4 = vld [vmem:[%s2821_s22] sm:$0xff]  ;;  %v286_v6 = vld [vmem:[%s2821_s22 + $0x8] sm:$0xff]  ;;  %322 = vst.msk [vmem:[#allocation2 + $0x39] sm:$0xff] %vm318_vm2, %v288_v8  ;;  %s2769_s28 = smov 12   ;;  %s2770_s29 = smov 16  }
  0x32   : > { %321 = vst.msk [vmem:[#allocation2 + $0x31] sm:$0xff] %vm318_vm2, %v287_v3  ;;  %v289_v5 = vld [vmem:[%s2821_s22 + $0x20] sm:$0xff]  ;;  %319 = vst.msk [vmem:[#allocation2 + $0x19] sm:$0xff] %vm318_vm2, %v285_v4  ;;  %v291_v7 = vld [vmem:[%s2821_s22 + $0x30] sm:$0xff]  ;;  %s2771_s30 = smov 20   ;;  %vm2029_vm3 = vcmask 1043456  }
  0x33   : > { %323 = vst.msk [vmem:[#allocation2 + $0x49] sm:$0xff] %vm318_vm2, %v289_v5  ;;  %320 = vst.msk [vmem:[#allocation2 + $0x21] sm:$0xff] %vm318_vm2, %v286_v6  ;;  %v293_v9 = vld [vmem:[%s2821_s22 + $0x40] sm:$0xff]  ;;  %v290_v10 = vld [vmem:[%s2821_s22 + $0x28] sm:$0xff]  ;;  %s2772_s8 = smov 24   ;;  %s2773_s17 = smov 32  }
  0x34   : > { %325 = vst.msk [vmem:[#allocation2 + $0x61] sm:$0xff] %vm318_vm2, %v291_v7  ;;  %327 = vst.msk [vmem:[#allocation2 + $0x79] sm:$0xff] %vm318_vm2, %v293_v9  ;;  %v295_v11 = vld [vmem:[%s2821_s22 + $0x50] sm:$0xff]  ;;  %v292_v12 = vld [vmem:[%s2821_s22 + $0x38] sm:$0xff]  ;;  %s2774_s3 = smov 28   ;;  %vm1696_vm4 = vcmask 64512  }
  0x35   : > { %324 = vst.msk [vmem:[#allocation2 + $0x51] sm:$0xff] %vm318_vm2, %v290_v10  ;;  %329 = vst.msk [vmem:[#allocation2 + $0x91] sm:$0xff] %vm318_vm2, %v295_v11  ;;  %v297_v13 = vld [vmem:[%s2821_s22 + $0x60] sm:$0xff]  ;;  %v294_v14 = vld [vmem:[%s2821_s22 + $0x48] sm:$0xff]  ;;  %674 = vrot.lane.b32.xlu0 %v384_v2, %s2767_s26  ;;  %vm1729_vm5 = vcmask 97280   ;;  %vm1762_vm6 = vcmask 130048  }
  0x36   : > { %326 = vst.msk [vmem:[#allocation2 + $0x69] sm:$0xff] %vm318_vm2, %v292_v12  ;;  %v299_v15 = vld [vmem:[%s2821_s22 + $0x70] sm:$0xff]  ;;  %331 = vst.msk [vmem:[#allocation2 + $0xa9] sm:$0xff] %vm318_vm2, %v297_v13  ;;  %v296_v16 = vld [vmem:[%s2821_s22 + $0x58] sm:$0xff]  ;;  %vm1795_vm7 = vcmask 162816   ;;  %vm1861_vm8 = vcmask 228352  }
  0x37   : > { %328 = vst.msk [vmem:[#allocation2 + $0x81] sm:$0xff] %vm318_vm2, %v294_v14  ;;  %333 = vst.msk [vmem:[#allocation2 + $0xc1] sm:$0xff] %vm318_vm2, %v299_v15  ;;  %v301_v17 = vld [vmem:[%s2821_s22 + $0x80] sm:$0xff]  ;;  %v298_v18 = vld [vmem:[%s2821_s22 + $0x68] sm:$0xff]  ;;  %vm1828_vm9 = vcmask 195584   ;;  %vm1894_vm10 = vcmask 261120  }
  0x38   : > { %330 = vst.msk [vmem:[#allocation2 + $0x99] sm:$0xff] %vm318_vm2, %v296_v16  ;;  %335 = vst.msk [vmem:[#allocation2 + $0xd9] sm:$0xff] %vm318_vm2, %v301_v17  ;;  %v303_v19 = vld [vmem:[%s2821_s22 + $0x90] sm:$0xff]  ;;  %v300_v20 = vld [vmem:[%s2821_s22 + $0x78] sm:$0xff]  ;;  %vm1932_vm11 = vcmask 293888   ;;  %vm2429_vm12 = vcmask 1040384  }
  0x39   : > { %332 = vst.msk [vmem:[#allocation2 + $0xb1] sm:$0xff] %vm318_vm2, %v298_v18  ;;  %v305_v21 = vld [vmem:[%s2821_s22 + $0xa0] sm:$0xff]  ;;  %337 = vst.msk [vmem:[#allocation2 + $0xf1] sm:$0xff] %vm318_vm2, %v303_v19  ;;  %v302_v22 = vld [vmem:[%s2821_s22 + $0x88] sm:$0xff]  ;;  %s2775_s19 = smov [#allocation3]   ;;  %vm2432_vm13 = vcmask 25600  }
  0x3a   : > { %334 = vst.msk [vmem:[#allocation2 + $0xc9] sm:$0xff] %vm318_vm2, %v300_v20  ;;  %339 = vst.msk [vmem:[#allocation2 + $0x109] sm:$0xff] %vm318_vm2, %v305_v21  ;;  %v307_v23 = vld [vmem:[%s2821_s22 + $0xb0] sm:$0xff]  ;;  %v304_v24 = vld [vmem:[%s2821_s22 + $0x98] sm:$0xff]  ;;  %s2481_s20 = sshll.u32 %s2775_s19, 4  ;;  %p2703_p5 = scmp.eq.s32.totalorder %s2812_s2, 1  ;;  %s2482_s20 = int_to_ptr.vmem [resolvable:$true] %s2481_s20 }
  0x3b   : > { %v2927_v25 = vld [vmem:[#allocation2 + $0x31] sm:$0xff]  ;;  %336 = vst.msk [vmem:[#allocation2 + $0xe1] sm:$0xff] %vm318_vm2, %v302_v22  ;;  %341 = vst.msk [vmem:[#allocation2 + $0x121] sm:$0xff] %vm318_vm2, %v307_v23  ;;  %v309_v26 = vld [vmem:[%s2821_s22 + $0xc0] sm:$0xff]  ;;  %s2730_s21 = scalar_lea.vmem %s2482_s20, 32  ;;  %p2737_p9 = scmp.lt.s32.totalorder %s2482_s20, %s2482_s20 }
  0x3c   : > { %338 = vst.msk [vmem:[#allocation2 + $0xf9] sm:$0xff] %vm318_vm2, %v304_v24  ;;  %v306_v27 = vld [vmem:[%s2821_s22 + $0xa8] sm:$0xff]  ;;  %680 = vrot.lane.b32.xlu0 %v2927_v25, %s2767_s26  ;;  %v2936_v28 = vld [vmem:[#allocation2 + $0x19] sm:$0xff]  ;;  %343 = vst.msk [vmem:[#allocation2 + $0x139] sm:$0xff] %vm318_vm2, %v309_v26  ;;  %p2731_p6 = scmp.ne.s32.totalorder %s2482_s20, %s2730_s21  ;;  %p2738_p10 = scmp.lt.s32.totalorder %s2730_s21, %s2730_s21 }
  0x3d   : > { %340 = vst.msk [vmem:[#allocation2 + $0x111] sm:$0xff] %vm318_vm2, %v306_v27  ;;  %676 = vrot.lane.b32.xlu1 %v2936_v28, %s2767_s26  ;;  %v2942_v29 = vld [vmem:[#allocation2 + $0x49] sm:$0xff]  ;;  %v2944_v30 = vld [vmem:[#allocation2 + $0x21] sm:$0xff]  ;;  %v2952_v32 = vld [vmem:[#allocation2 + $0x39] sm:$0xff] }
  0x3e   : > { %v2950_v31 = vld [vmem:[#allocation2 + $0x61] sm:$0xff]  ;;  %v311_v33 = vld [vmem:[%s2821_s22 + $0xd0] sm:$0xff]  ;;  %v308_v34 = vld [vmem:[%s2821_s22 + $0xb8] sm:$0xff]  ;;  %p2732_p7 = pnand %p2731_p6, %p2703_p5  ;;  %p2739_p11 = por %p2738_p10, %p2737_p9 }
  0x3f   : > { %345 = vst.msk [vmem:[#allocation2 + $0x151] sm:$0xff] %vm318_vm2, %v311_v33  ;;  %v313_v35 = vld [vmem:[%s2821_s22 + $0xe0] sm:$0xff]  ;;  %v310_v36 = vld [vmem:[%s2821_s22 + $0xc8] sm:$0xff]  ;;  %342 = vst.msk [vmem:[#allocation2 + $0x129] sm:$0xff] %vm318_vm2, %v308_v34 }
  0x40   : > { %684 = vrot.lane.b32.xlu0 %v2942_v29, %s2767_s26  ;;  %v2963_v37 = vld [vmem:[#allocation2 + $0x79] sm:$0xff]  ;;  %347 = vst.msk [vmem:[#allocation2 + $0x169] sm:$0xff] %vm318_vm2, %v313_v35  ;;  %344 = vst.msk [vmem:[#allocation2 + $0x141] sm:$0xff] %vm318_vm2, %v310_v36  ;;  %v2969_v39 = vld [vmem:[#allocation2 + $0x51] sm:$0xff]  ;;  %p2733_p8 = pneg %p2732_p7 }
  0x41   : > { %678 = vrot.lane.b32.xlu1 %v2944_v30, %s2767_s26  ;;  %v312_v38 = vld [vmem:[%s2821_s22 + $0xd8] sm:$0xff]  ;;  %v314_v40 = vld [vmem:[%s2821_s22 + $0xe8] sm:$0xff] }
  0x42   : > { %346 = vst.msk [vmem:[#allocation2 + $0x159] sm:$0xff] %vm318_vm2, %v312_v38  ;;  %348 = vst.msk [vmem:[#allocation2 + $0x171] sm:$0xff] %vm318_vm2, %v314_v40  ;;  %v2978_v41 = vld [vmem:[#allocation2 + $0x91] sm:$0xff]  ;;  %v2980_v42 = vld [vmem:[#allocation2 + $0x69] sm:$0xff]  ;;  %p2740_p12 = pnand %p2739_p11, %p2733_p8 }
  0x43   : > { %v2986_v43 = vld [vmem:[#allocation2 + $0xa9] sm:$0xff]  ;;  %v2988_v44 = vld [vmem:[#allocation2 + $0x81] sm:$0xff]  ;;  %v2994_v46 = vld [vmem:[#allocation2 + $0x99] sm:$0xff] }
  0x44   : > { %688 = vrot.lane.b32.xlu0 %v2950_v31, %s2767_s26  ;;  %v399_v45 = vld [vmem:[#allocation2 + $0xc1] sm:$0xff]  ;;  %v401_v47 = vld [vmem:[#allocation2 + $0xd9] sm:$0xff]  ;;  %v2999_v48 = vld [vmem:[#allocation2 + $0xb1] sm:$0xff] }
  0x45   : > { %682 = vrot.lane.b32.xlu1 %v2952_v32, %s2767_s26  ;;  %v403_v49 = vld [vmem:[#allocation2 + $0xf1] sm:$0xff]  ;;  %v400_v50 = vld [vmem:[#allocation2 + $0xc9] sm:$0xff]  ;;  %v402_v52 = vld [vmem:[#allocation2 + $0xe1] sm:$0xff] }
  0x46   : > { %v405_v51 = vld [vmem:[#allocation2 + $0x109] sm:$0xff]  ;;  %v407_v53 = vld [vmem:[#allocation2 + $0x121] sm:$0xff]  ;;  %v404_v54 = vld [vmem:[#allocation2 + $0xf9] sm:$0xff] }
  0x47   : > { %v409_v55 = vld [vmem:[#allocation2 + $0x139] sm:$0xff]  ;;  %v406_v56 = vld [vmem:[#allocation2 + $0x111] sm:$0xff]  ;;  %v408_v58 = vld [vmem:[#allocation2 + $0x129] sm:$0xff] }
  0x48   : > { %692 = vrot.lane.b32.xlu0 %v2963_v37, %s2767_s26  ;;  %v411_v57 = vld [vmem:[#allocation2 + $0x151] sm:$0xff]  ;;  %v413_v59 = vld [vmem:[#allocation2 + $0x169] sm:$0xff]  ;;  %v410_v60 = vld [vmem:[#allocation2 + $0x141] sm:$0xff] }
  0x49   : > { %686 = vrot.lane.b32.xlu1 %v2969_v39, %s2767_s26  ;;  %v415_v61 = vld [vmem:[#allocation2 + $0x2] sm:$0xff]  ;;  %v412_v62 = vld [vmem:[#allocation2 + $0x159] sm:$0xff]  ;;  %v414_v0 = vld [vmem:[#allocation2 + $0x171] sm:$0xff] }
  0x4a   : > { %v3018_v63 = vld [vmem:[#allocation2 + $0x1a] sm:$0xff]  ;;  %v3023_v1 = vld [vmem:[#allocation2 + $0x32] sm:$0xff]  ;;  %v416_v2 = vld [vmem:[#allocation2 + $0xa] sm:$0xff] }
  0x4b   : > { %v3028_v3 = vld [vmem:[#allocation2 + $0x4a] sm:$0xff]  ;;  %v3030_v4 = vld [vmem:[#allocation2 + $0x22] sm:$0xff]  ;;  %v3038_v6 = vld [vmem:[#allocation2 + $0x3a] sm:$0xff] }
  0x4c   : > { %696 = vrot.lane.b32.xlu0 %v2978_v41, %s2767_s26  ;;  %v3036_v5 = vld [vmem:[#allocation2 + $0x62] sm:$0xff]  ;;  %v3044_v7 = vld [vmem:[#allocation2 + $0x7a] sm:$0xff]  ;;  %v3046_v8 = vld [vmem:[#allocation2 + $0x52] sm:$0xff] }
  0x4d   : > { %690 = vrot.lane.b32.xlu1 %v2980_v42, %s2767_s26  ;;  %v3052_v9 = vld [vmem:[#allocation2 + $0x92] sm:$0xff]  ;;  %v3054_v10 = vld [vmem:[#allocation2 + $0x6a] sm:$0xff]  ;;  %v3062_v12 = vld [vmem:[#allocation2 + $0x82] sm:$0xff] }
  0x4e   : > { %v3060_v11 = vld [vmem:[#allocation2 + $0xaa] sm:$0xff]  ;;  %v3068_v13 = vld [vmem:[#allocation2 + $0xc2] sm:$0xff]  ;;  %v3070_v14 = vld [vmem:[#allocation2 + $0x9a] sm:$0xff] }
  0x4f   : > { %v3076_v15 = vld [vmem:[#allocation2 + $0xda] sm:$0xff]  ;;  %v3078_v16 = vld [vmem:[#allocation2 + $0xb2] sm:$0xff]  ;;  %v3084_v18 = vld [vmem:[#allocation2 + $0xca] sm:$0xff] }
  0x50   : > { %700 = vrot.lane.b32.xlu0 %v2986_v43, %s2767_s26  ;;  %v435_v17 = vld [vmem:[#allocation2 + $0xf2] sm:$0xff]  ;;  %v437_v19 = vld [vmem:[#allocation2 + $0x10a] sm:$0xff]  ;;  %v3089_v20 = vld [vmem:[#allocation2 + $0xe2] sm:$0xff] }
  0x51   : > { %694 = vrot.lane.b32.xlu1 %v2988_v44, %s2767_s26  ;;  %v439_v21 = vld [vmem:[#allocation2 + $0x122] sm:$0xff]  ;;  %v436_v22 = vld [vmem:[#allocation2 + $0xfa] sm:$0xff]  ;;  %v438_v26 = vld [vmem:[#allocation2 + $0x112] sm:$0xff] }
  0x52   : > { %v441_v23 = vld [vmem:[#allocation2 + $0x13a] sm:$0xff]  ;;  %v443_v27 = vld [vmem:[#allocation2 + $0x152] sm:$0xff]  ;;  %v440_v34 = vld [vmem:[#allocation2 + $0x12a] sm:$0xff] }
  0x53   : > { %v445_v35 = vld [vmem:[#allocation2 + $0x16a] sm:$0xff]  ;;  %v442_v38 = vld [vmem:[#allocation2 + $0x142] sm:$0xff] }
  0x54   : > { %704 = vrot.lane.b32.xlu0 %v399_v45, %s2767_s26 }
  0x55   : > { %698 = vrot.lane.b32.xlu1 %v2994_v46, %s2767_s26 }
  0x58   : > { %708 = vrot.lane.b32.xlu0 %v401_v47, %s2767_s26  ;;  %v444_v47 = vld [vmem:[#allocation2 + $0x15a] sm:$0xff] }
  0x59   : > { %702 = vrot.lane.b32.xlu1 %v2999_v48, %s2767_s26 }
  0x5c   : > { %712 = vrot.lane.b32.xlu0 %v403_v49, %s2767_s26  ;;  %v3112_v49 = vld [vmem:[#allocation2 + $0x18] sm:$0xff] }
  0x5d   : > { %706 = vrot.lane.b32.xlu1 %v400_v50, %s2767_s26 }
  0x60   : > { %716 = vrot.lane.b32.xlu0 %v405_v51, %s2767_s26 }
  0x61   : > { %710 = vrot.lane.b32.xlu1 %v402_v52, %s2767_s26  ;;  %v446_v52 = vld [vmem:[#allocation2 + $0x172] sm:$0xff] }
  0x64   : > { %720 = vrot.lane.b32.xlu0 %v407_v53, %s2767_s26  ;;  %v3121_v53 = vld [vmem:[#allocation2 + $0x30] sm:$0xff] }
  0x65   : > { %714 = vrot.lane.b32.xlu1 %v404_v54, %s2767_s26 }
  0x68   : > { %724 = vrot.lane.b32.xlu0 %v409_v55, %s2767_s26 }
  0x69   : > { %718 = vrot.lane.b32.xlu1 %v406_v56, %s2767_s26  ;;  %v3130_v56 = vld [vmem:[#allocation2 + $0x48] sm:$0xff] }
  0x6c   : > { %728 = vrot.lane.b32.xlu0 %v411_v57, %s2767_s26 }
  0x6d   : > { %722 = vrot.lane.b32.xlu1 %v408_v58, %s2767_s26  ;;  %v3134_v58 = vld [vmem:[#allocation2 + $0x20] sm:$0xff] }
  0x70   : > { %732 = vrot.lane.b32.xlu0 %v413_v59, %s2767_s26 }
  0x71   : > { %726 = vrot.lane.b32.xlu1 %v410_v60, %s2767_s26  ;;  %v3142_v60 = vld [vmem:[#allocation2 + $0x60] sm:$0xff] }
  0x74   : > { %800 = vrot.lane.b32.xlu0 %v415_v61, %s2768_s27 }
  0x75   : > { %730 = vrot.lane.b32.xlu1 %v412_v62, %s2767_s26  ;;  %v3146_v62 = vld [vmem:[#allocation2 + $0x38] sm:$0xff] }
  0x76   : > { %4215 = vst [vmem:[#allocation12_spill] sm:$0xff] %v3146_v62 }
  0x78   : > { %804 = vrot.lane.b32.xlu0 %v3018_v63, %s2768_s27 }
  0x79   : > { %734 = vrot.lane.b32.xlu1 %v414_v0, %s2767_s26 }
  0x7c   : > { %808 = vrot.lane.b32.xlu0 %v3023_v1, %s2768_s27 }
  0x7d   : > { %802 = vrot.lane.b32.xlu1 %v416_v2, %s2768_s27  ;;  %v3154_v2 = vld [vmem:[#allocation2 + $0x78] sm:$0xff] }
  0x80   : > { %812 = vrot.lane.b32.xlu0 %v3028_v3, %s2768_s27 }
  0x81   : > { %806 = vrot.lane.b32.xlu1 %v3030_v4, %s2768_s27 }
  0x84   : > { %816 = vrot.lane.b32.xlu0 %v3036_v5, %s2768_s27 }
  0x85   : > { %810 = vrot.lane.b32.xlu1 %v3038_v6, %s2768_s27 }
  0x88   : > { %820 = vrot.lane.b32.xlu0 %v3044_v7, %s2768_s27 }
  0x89   : > { %814 = vrot.lane.b32.xlu1 %v3046_v8, %s2768_s27 }
  0x8c   : > { %824 = vrot.lane.b32.xlu0 %v3052_v9, %s2768_s27 }
  0x8d   : > { %818 = vrot.lane.b32.xlu1 %v3054_v10, %s2768_s27 }
  0x90   : > { %828 = vrot.lane.b32.xlu0 %v3060_v11, %s2768_s27 }
  0x91   : > { %822 = vrot.lane.b32.xlu1 %v3062_v12, %s2768_s27 }
  0x94   : > { %832 = vrot.lane.b32.xlu0 %v3068_v13, %s2768_s27 }
  0x95   : > { %826 = vrot.lane.b32.xlu1 %v3070_v14, %s2768_s27 }
  0x98   : > { %836 = vrot.lane.b32.xlu0 %v3076_v15, %s2768_s27 }
  0x99   : > { %830 = vrot.lane.b32.xlu1 %v3078_v16, %s2768_s27 }
  0x9c   : > { %840 = vrot.lane.b32.xlu0 %v435_v17, %s2768_s27 }
  0x9d   : > { %834 = vrot.lane.b32.xlu1 %v3084_v18, %s2768_s27 }
  0xa0   : > { %844 = vrot.lane.b32.xlu0 %v437_v19, %s2768_s27  ;;  %v3158_v19 = vld [vmem:[#allocation2 + $0x50] sm:$0xff] }
  0xa1   : > { %838 = vrot.lane.b32.xlu1 %v3089_v20, %s2768_s27 }
  0xa3   : > { %v3096_v24 = vpop.permute.xlu0 %672 }
  0xa4   : > { %848 = vrot.lane.b32.xlu0 %v439_v21, %s2768_s27 }
  0xa5   : > { %842 = vrot.lane.b32.xlu1 %v436_v22, %s2768_s27  ;;  %v3166_v22 = vld [vmem:[#allocation2 + $0x90] sm:$0xff] }
  0xa7   : > { %v3100_v33 = vpop.permute.xlu0 %674 }
  0xa8   : > { %852 = vrot.lane.b32.xlu0 %v441_v23, %s2768_s27 }
  0xa9   : > { %846 = vrot.lane.b32.xlu1 %v438_v26, %s2768_s27  ;;  %v3170_v26 = vld [vmem:[#allocation2 + $0x68] sm:$0xff] }
  0xac   : > { %856 = vrot.lane.b32.xlu0 %v443_v27, %s2768_s27 }
  0xad   : > { %850 = vrot.lane.b32.xlu1 %v440_v34, %s2768_s27  ;;  %v3178_v34 = vld [vmem:[#allocation2 + $0xa8] sm:$0xff] }
  0xae   : > { %v3104_v36 = vpop.permute.xlu0 %680  ;;  %4221 = vst [vmem:[#allocation18_spill] sm:$0xff] %v3178_v34 }
  0xaf   : > { %v3106_v40 = vpop.permute.xlu1 %676 }
  0xb0   : > { %860 = vrot.lane.b32.xlu0 %v445_v35, %s2768_s27 }
  0xb1   : > { %854 = vrot.lane.b32.xlu1 %v442_v38, %s2768_s27  ;;  %v3182_v38 = vld [vmem:[#allocation2 + $0x80] sm:$0xff] }
  0xb2   : > { %v3110_v45 = vpop.permute.xlu0 %684 }
  0xb3   : > { %4209 = vst [vmem:[#allocation6_spill] sm:$0xff] %v3110_v45  ;;  %v3114_v50 = vpop.permute.xlu1 %678 }
  0xb4   : > { %928 = vrot.lane.b32.xlu0 %v3112_v49, %s2769_s28 }
  0xb5   : > { %858 = vrot.lane.b32.xlu1 %v444_v47, %s2768_s27 }
  0xb6   : > { %v3119_v51 = vpop.permute.xlu0 %688 }
  0xb7   : > { %4210 = vst [vmem:[#allocation7_spill] sm:$0xff] %v3119_v51  ;;  %v3123_v54 = vpop.permute.xlu1 %682  ;;  %v3230_v51 = vld [vmem:[#allocation2 + $0xe0] sm:$0xff] }
  0xb8   : > { %932 = vrot.lane.b32.xlu0 %v3121_v53, %s2769_s28 }
  0xb9   : > { %862 = vrot.lane.b32.xlu1 %v446_v52, %s2768_s27  ;;  %v3190_v52 = vld [vmem:[#allocation2 + $0xc0] sm:$0xff] }
  0xba   : > { %v3128_v55 = vpop.permute.xlu0 %692 }
  0xbb   : > { %4211 = vst [vmem:[#allocation8_spill] sm:$0xff] %v3128_v55  ;;  %v3132_v57 = vpop.permute.xlu1 %686  ;;  %v3218_v55 = vld [vmem:[#allocation2 + $0xc8] sm:$0xff] }
  0xbc   : > { %4212 = vst [vmem:[#allocation9_spill] sm:$0xff] %v3132_v57  ;;  %936 = vrot.lane.b32.xlu0 %v3130_v56, %s2769_s28  ;;  %v3240_v57 = vld [vmem:[#allocation2 + $0xf8] sm:$0xff] }
  0xbd   : > { %930 = vrot.lane.b32.xlu1 %v3134_v58, %s2769_s28 }
  0xbe   : > { %v3140_v59 = vpop.permute.xlu0 %696 }
  0xbf   : > { %4213 = vst [vmem:[#allocation10_spill] sm:$0xff] %v3140_v59  ;;  %v3144_v61 = vpop.permute.xlu1 %690  ;;  %v3206_v59 = vld [vmem:[#allocation2 + $0xb0] sm:$0xff] }
  0xc0   : > { %4214 = vst [vmem:[#allocation11_spill] sm:$0xff] %v3144_v61  ;;  %940 = vrot.lane.b32.xlu0 %v3142_v60, %s2769_s28  ;;  %4228 = vst [vmem:[#allocation25_spill] sm:$0xff] %v3206_v59 }
  0xc1   : > { %934 = vrot.lane.b32.xlu1 %v3146_v62, %s2769_s28 }
  0xc2   : > { %v3152_v0 = vpop.permute.xlu0 %700 }
  0xc3   : > { %4216 = vst [vmem:[#allocation13_spill] sm:$0xff] %v3152_v0  ;;  %v3156_v17 = vpop.permute.xlu1 %694  ;;  %v3194_v0 = vld [vmem:[#allocation2 + $0x98] sm:$0xff] }
  0xc4   : > { %4217 = vst [vmem:[#allocation14_spill] sm:$0xff] %v3156_v17  ;;  %944 = vrot.lane.b32.xlu0 %v3154_v2, %s2769_s28  ;;  %4225 = vst [vmem:[#allocation22_spill] sm:$0xff] %v3194_v0 }
  0xc5   : > { %938 = vrot.lane.b32.xlu1 %v3158_v19, %s2769_s28 }
  0xc6   : > { %v3164_v21 = vpop.permute.xlu0 %704 }
  0xc7   : > { %4218 = vst [vmem:[#allocation15_spill] sm:$0xff] %v3164_v21  ;;  %v3168_v23 = vpop.permute.xlu1 %698 }
  0xc8   : > { %4219 = vst [vmem:[#allocation16_spill] sm:$0xff] %v3168_v23  ;;  %948 = vrot.lane.b32.xlu0 %v3166_v22, %s2769_s28 }
  0xc9   : > { %942 = vrot.lane.b32.xlu1 %v3170_v26, %s2769_s28 }
  0xca   : > { %v3176_v27 = vpop.permute.xlu0 %708 }
  0xcb   : > { %4220 = vst [vmem:[#allocation17_spill] sm:$0xff] %v3176_v27  ;;  %v3180_v35 = vpop.permute.xlu1 %702 }
  0xcc   : > { %4222 = vst [vmem:[#allocation19_spill] sm:$0xff] %v3180_v35  ;;  %952 = vrot.lane.b32.xlu0 %v3178_v34, %s2769_s28  ;;  %v3202_v35 = vld [vmem:[#allocation2 + $0xd8] sm:$0xff] }
  0xcd   : > { %946 = vrot.lane.b32.xlu1 %v3182_v38, %s2769_s28 }
  0xce   : > { %v3188_v47 = vpop.permute.xlu0 %712 }
  0xcf   : > { %4223 = vst [vmem:[#allocation20_spill] sm:$0xff] %v3188_v47  ;;  %v3192_v21 = vpop.permute.xlu1 %706 }
  0xd0   : > { %4224 = vst [vmem:[#allocation21_spill] sm:$0xff] %v3192_v21  ;;  %956 = vrot.lane.b32.xlu0 %v3190_v52, %s2769_s28  ;;  %v3214_v21 = vld [vmem:[#allocation2 + $0xf0] sm:$0xff] }
  0xd1   : > { %950 = vrot.lane.b32.xlu1 %v3194_v0, %s2769_s28 }
  0xd2   : > { %v3200_v27 = vpop.permute.xlu0 %716 }
  0xd3   : > { %4226 = vst [vmem:[#allocation23_spill] sm:$0xff] %v3200_v27  ;;  %v3204_v23 = vpop.permute.xlu1 %710 }
  0xd4   : > { %4227 = vst [vmem:[#allocation24_spill] sm:$0xff] %v3204_v23  ;;  %960 = vrot.lane.b32.xlu0 %v3202_v35, %s2769_s28  ;;  %v3226_v23 = vld [vmem:[#allocation2 + $0x108] sm:$0xff] }
  0xd5   : > { %954 = vrot.lane.b32.xlu1 %v3206_v59, %s2769_s28  ;;  %4232 = vst [vmem:[#allocation29_spill] sm:$0xff] %v3226_v23 }
  0xd6   : > { %v3212_v47 = vpop.permute.xlu0 %720 }
  0xd7   : > { %4229 = vst [vmem:[#allocation26_spill] sm:$0xff] %v3212_v47  ;;  %v3216_v17 = vpop.permute.xlu1 %714 }
  0xd8   : > { %4230 = vst [vmem:[#allocation27_spill] sm:$0xff] %v3216_v17  ;;  %964 = vrot.lane.b32.xlu0 %v3214_v21, %s2769_s28 }
  0xd9   : > { %958 = vrot.lane.b32.xlu1 %v3218_v55, %s2769_s28 }
  0xda   : > { %v3224_v27 = vpop.permute.xlu0 %724 }
  0xdb   : > { %4231 = vst [vmem:[#allocation28_spill] sm:$0xff] %v3224_v27  ;;  %v3228_v61 = vpop.permute.xlu1 %718 }
  0xdc   : > { %4233 = vst [vmem:[#allocation30_spill] sm:$0xff] %v3228_v61  ;;  %968 = vrot.lane.b32.xlu0 %v3226_v23, %s2769_s28 }
  0xdd   : > { %962 = vrot.lane.b32.xlu1 %v3230_v51, %s2769_s28 }
  0xde   : > { %v3236_v47 = vpop.permute.xlu0 %728 }
  0xdf   : > { %4234 = vst [vmem:[#allocation31_spill] sm:$0xff] %v3236_v47  ;;  %v3238_v17 = vpop.permute.xlu1 %722 }
  0xe0   : > { %4235 = vst [vmem:[#allocation32_spill] sm:$0xff] %v3238_v17  ;;  %1058 = vrot.lane.b32.xlu0 %v2944_v30, %s2770_s29  ;;  %v1931_v30 = vld [vmem:[%s4199_s1 + $0x20] sm:$0xf] }
  0xe1   : > { %966 = vrot.lane.b32.xlu1 %v3240_v57, %s2769_s28  ;;  %2631 = vmatprep.subr.msk.mxu0 %vm2029_vm3, %v1931_v30 }
  0xe2   : > { %v3246_v27 = vpop.permute.xlu0 %732  ;;  %2689 = vmatprep.subr.msk.mxu1 %vm2029_vm3, %v1931_v30  ;;  %2632 = vmatpush3.msk.msra.mxu0 %vm2029_vm3, %v1931_v30 }
  0xe3   : > { %4236 = vst [vmem:[#allocation33_spill] sm:$0xff] %v3246_v27  ;;  %v3248_v61 = vpop.permute.xlu1 %726  ;;  %2694 = vmatpush3.msk.msra.mxu1 %vm2029_vm3, %v1931_v30  ;;  %v1927_v30 = vld [vmem:[%s4199_s1] sm:$0xff] }
  0xe4   : > { %4237 = vst [vmem:[#allocation34_spill] sm:$0xff] %v3248_v61  ;;  %1186 = vrot.lane.b32.xlu0 %v3030_v4, %s2771_s30  ;;  %v1929_v4 = vld [vmem:[%s4199_s1 + $0x10] sm:$0xff] }
  0xe5   : > { %1056 = vrot.lane.b32.xlu1 %v2936_v28, %s2770_s29  ;;  %v1930_v28 = vld [vmem:[%s4199_s1 + $0x18] sm:$0xff] }
  0xe6   : > { %v3254_v47 = vpop.permute.xlu0 %800  ;;  %2633 = vmatprep.subr.mxu0 %v1930_v28  ;;  %2690 = vmatprep.subr.mxu1 %v1930_v28 }
  0xe7   : > { %v3259_v17 = vpop.permute.xlu1 %730  ;;  %2634 = vmatpush3.msra.mxu0 %v1930_v28  ;;  %2695 = vmatpush3.msra.mxu1 %v1930_v28 }
  0xe8   : > { %4238 = vst [vmem:[#allocation35_spill] sm:$0xff] %v3259_v17  ;;  %1314 = vrot.lane.b32.xlu0 %v3146_v62, %s2772_s8  ;;  %2635 = vmatprep.subr.mxu0 %v1929_v4 }
  0xe9   : > { %1184 = vrot.lane.b32.xlu1 %v3018_v63, %s2771_s30  ;;  %2636 = vmatpush3.msra.mxu0 %v1929_v4  ;;  %v1928_v63 = vld [vmem:[%s4199_s1 + $0x8] sm:$0xff] }
  0xea   : > { %v3271_v27 = vpop.permute.xlu0 %804  ;;  %2637 = vmatprep.subr.mxu0 %v1928_v63  ;;  %2691 = vmatprep.subr.mxu1 %v1929_v4 }
  0xeb   : > { %v3273_v17 = vpop.permute.xlu1 %734  ;;  %2638 = vmatpush3.msra.mxu0 %v1928_v63  ;;  %2696 = vmatpush3.msra.mxu1 %v1929_v4 }
  0xec   : > { %4239 = vst [vmem:[#allocation36_spill] sm:$0xff] %v3273_v17  ;;  %1060 = vrot.lane.b32.xlu0 %v2927_v25, %s2770_s29  ;;  %2639 = vmatprep.subr.mxu0 %v1927_v30 }
  0xed   : > { %1312 = vrot.lane.b32.xlu1 %v3121_v53, %s2772_s8  ;;  %2640 = vmatpush3.msra.mxu0 %v1927_v30 }
  0xee   : > { %v3285_v61 = vpop.permute.xlu0 %808  ;;  %2692 = vmatprep.subr.mxu1 %v1928_v63 }
  0xef   : > { %v3287_v17 = vpop.permute.xlu1 %802  ;;  %2697 = vmatpush3.msra.mxu1 %v1928_v63 }
  0xf0   : > { %1568 = vrot.lane.b32.xlu0 %v3023_v1, %s2773_s17  ;;  %2693 = vmatprep.subr.mxu1 %v1927_v30 }
  0xf1   : > { %1440 = vrot.lane.b32.xlu1 %v2927_v25, %s2774_s3  ;;  %2698 = vmatpush3.msra.mxu1 %v1927_v30 }
  0xf2   : > { %v3293_v23 = vpop.permute.xlu0 %812 }
  0xf3   : > { %v3295_v45 = vpop.permute.xlu1 %806 }
  0xf4   : > { %1188 = vrot.lane.b32.xlu0 %v3023_v1, %s2771_s30 }
  0xf5   : > { %1442 = vrot.lane.b32.xlu1 %v2952_v32, %s2774_s3 }
  0xf6   : > { %v3301_v28 = vpop.permute.xlu0 %816 }
  0xf7   : > { %v3303_v62 = vpop.permute.xlu1 %810 }
  0xf8   : > { %1190 = vrot.lane.b32.xlu0 %v3038_v6, %s2771_s30 }
  0xf9   : > { %1062 = vrot.lane.b32.xlu1 %v2952_v32, %s2770_s29 }
  0xfa   : > { %v3309_v25 = vpop.permute.xlu0 %820 }
  0xfb   : > { %4240 = vst [vmem:[#allocation37_spill] sm:$0xff] %v3309_v25  ;;  %v3311_v4 = vpop.permute.xlu1 %814 }
  0xfc   : > { %1318 = vrot.lane.b32.xlu0 %v3158_v19, %s2772_s8 }
  0xfd   : > { %1570 = vrot.lane.b32.xlu1 %v3038_v6, %s2773_s17 }
  0xfe   : > { %v3317_v1 = vpop.permute.xlu0 %824 }
  0xff   : > { %4241 = vst [vmem:[#allocation38_spill] sm:$0xff] %v3317_v1  ;;  %v3319_v63 = vpop.permute.xlu1 %818 }
 0x100   : > { %1064 = vrot.lane.b32.xlu0 %v2942_v29, %s2770_s29 }
 0x101   : > { %1316 = vrot.lane.b32.xlu1 %v3130_v56, %s2772_s8 }
 0x102   : > { %v3325_v32 = vpop.permute.xlu0 %828 }
 0x103   : > { %4242 = vst [vmem:[#allocation39_spill] sm:$0xff] %v3325_v32  ;;  %v3327_v30 = vpop.permute.xlu1 %822 }
 0x104   : > { %1572 = vrot.lane.b32.xlu0 %v3028_v3, %s2773_s17 }
 0x105   : > { %1444 = vrot.lane.b32.xlu1 %v2942_v29, %s2774_s3 }
 0x106   : > { %v3333_v6 = vpop.permute.xlu0 %832 }
 0x107   : > { %4243 = vst [vmem:[#allocation40_spill] sm:$0xff] %v3333_v6  ;;  %v3335_v1 = vpop.permute.xlu1 %826 }
 0x108   : > { %4244 = vst [vmem:[#allocation41_spill] sm:$0xff] %v3335_v1  ;;  %1192 = vrot.lane.b32.xlu0 %v3028_v3, %s2771_s30 }
 0x109   : > { %1446 = vrot.lane.b32.xlu1 %v2969_v39, %s2774_s3 }
 0x10a   : > { %v3341_v25 = vpop.permute.xlu0 %836 }
 0x10b   : > { %4245 = vst [vmem:[#allocation42_spill] sm:$0xff] %v3341_v25  ;;  %v3343_v32 = vpop.permute.xlu1 %830 }
 0x10c   : > { %4246 = vst [vmem:[#allocation43_spill] sm:$0xff] %v3343_v32  ;;  %1194 = vrot.lane.b32.xlu0 %v3046_v8, %s2771_s30 }
 0x10d   : > { %1066 = vrot.lane.b32.xlu1 %v2969_v39, %s2770_s29 }
 0x10e   : > { %v3349_v29 = vpop.permute.xlu0 %840 }
 0x10f   : > { %4247 = vst [vmem:[#allocation44_spill] sm:$0xff] %v3349_v29  ;;  %v3351_v6 = vpop.permute.xlu1 %834 }
 0x110   : > { %4248 = vst [vmem:[#allocation45_spill] sm:$0xff] %v3351_v6  ;;  %1322 = vrot.lane.b32.xlu0 %v3170_v26, %s2772_s8 }
 0x111   : > { %1574 = vrot.lane.b32.xlu1 %v3046_v8, %s2773_s17 }
 0x112   : > { %v3357_v3 = vpop.permute.xlu0 %844 }
 0x113   : > { %4249 = vst [vmem:[#allocation46_spill] sm:$0xff] %v3357_v3  ;;  %v3359_v25 = vpop.permute.xlu1 %838 }
 0x114   : > { %4250 = vst [vmem:[#allocation47_spill] sm:$0xff] %v3359_v25  ;;  %1068 = vrot.lane.b32.xlu0 %v2950_v31, %s2770_s29 }
 0x115   : > { %1320 = vrot.lane.b32.xlu1 %v3142_v60, %s2772_s8 }
 0x116   : > { %v3365_v39 = vpop.permute.xlu0 %848 }
 0x117   : > { %4251 = vst [vmem:[#allocation48_spill] sm:$0xff] %v3365_v39  ;;  %v3367_v29 = vpop.permute.xlu1 %842 }
 0x118   : > { %4252 = vst [vmem:[#allocation49_spill] sm:$0xff] %v3367_v29  ;;  %1576 = vrot.lane.b32.xlu0 %v3036_v5, %s2773_s17 }
 0x119   : > { %1448 = vrot.lane.b32.xlu1 %v2950_v31, %s2774_s3 }
 0x11a   : > { %v3373_v8 = vpop.permute.xlu0 %852 }
 0x11b   : > { %4253 = vst [vmem:[#allocation50_spill] sm:$0xff] %v3373_v8  ;;  %v3375_v3 = vpop.permute.xlu1 %846 }
 0x11c   : > { %4254 = vst [vmem:[#allocation51_spill] sm:$0xff] %v3375_v3  ;;  %1196 = vrot.lane.b32.xlu0 %v3036_v5, %s2771_s30 }
 0x11d   : > { %1450 = vrot.lane.b32.xlu1 %v2980_v42, %s2774_s3 }
 0x11e   : > { %v3381_v25 = vpop.permute.xlu0 %856 }
 0x11f   : > { %4255 = vst [vmem:[#allocation52_spill] sm:$0xff] %v3381_v25  ;;  %v3383_v39 = vpop.permute.xlu1 %850 }
 0x120   : > { %4256 = vst [vmem:[#allocation53_spill] sm:$0xff] %v3383_v39  ;;  %1198 = vrot.lane.b32.xlu0 %v3054_v10, %s2771_s30 }
 0x121   : > { %1070 = vrot.lane.b32.xlu1 %v2980_v42, %s2770_s29 }
 0x122   : > { %v3389_v31 = vpop.permute.xlu0 %860 }
 0x123   : > { %4257 = vst [vmem:[#allocation54_spill] sm:$0xff] %v3389_v31  ;;  %v3391_v8 = vpop.permute.xlu1 %854 }
 0x124   : > { %4258 = vst [vmem:[#allocation55_spill] sm:$0xff] %v3391_v8  ;;  %1326 = vrot.lane.b32.xlu0 %v3182_v38, %s2772_s8 }
 0x125   : > { %1578 = vrot.lane.b32.xlu1 %v3054_v10, %s2773_s17 }
 0x126   : > { %v3397_v5 = vpop.permute.xlu0 %928 }
 0x127   : > { %v3399_v25 = vpop.permute.xlu1 %858 }
 0x128   : > { %4259 = vst [vmem:[#allocation56_spill] sm:$0xff] %v3399_v25  ;;  %1072 = vrot.lane.b32.xlu0 %v2963_v37, %s2770_s29 }
 0x129   : > { %1324 = vrot.lane.b32.xlu1 %v3154_v2, %s2772_s8 }
 0x12a   : > { %v3405_v42 = vpop.permute.xlu0 %932 }
 0x12b   : > { %v3407_v31 = vpop.permute.xlu1 %862 }
 0x12c   : > { %4260 = vst [vmem:[#allocation57_spill] sm:$0xff] %v3407_v31  ;;  %1580 = vrot.lane.b32.xlu0 %v3044_v7, %s2773_s17 }
 0x12d   : > { %1452 = vrot.lane.b32.xlu1 %v2963_v37, %s2774_s3 }
 0x12e   : > { %v3413_v10 = vpop.permute.xlu0 %936 }
 0x12f   : > { %v3415_v8 = vpop.permute.xlu1 %930 }
 0x130   : > { %1200 = vrot.lane.b32.xlu0 %v3044_v7, %s2771_s30 }
 0x131   : > { %1454 = vrot.lane.b32.xlu1 %v2988_v44, %s2774_s3 }
 0x132   : > { %v3421_v25 = vpop.permute.xlu0 %940 }
 0x133   : > { %v3423_v39 = vpop.permute.xlu1 %934 }
 0x134   : > { %1202 = vrot.lane.b32.xlu0 %v3062_v12, %s2771_s30 }
 0x135   : > { %1074 = vrot.lane.b32.xlu1 %v2988_v44, %s2770_s29 }
 0x136   : > { %v3429_v37 = vpop.permute.xlu0 %944 }
 0x137   : > { %v3431_v31 = vpop.permute.xlu1 %938 }
 0x138   : > { %1330 = vrot.lane.b32.xlu0 %v3194_v0, %s2772_s8 }
 0x139   : > { %1582 = vrot.lane.b32.xlu1 %v3062_v12, %s2773_s17 }
 0x13a   : > { %v3437_v7 = vpop.permute.xlu0 %948 }
 0x13b   : > { %v3439_v3 = vpop.permute.xlu1 %942 }
 0x13c   : > { %1076 = vrot.lane.b32.xlu0 %v2978_v41, %s2770_s29 }
 0x13d   : > { %1328 = vrot.lane.b32.xlu1 %v3166_v22, %s2772_s8 }
 0x13e   : > { %v3445_v44 = vpop.permute.xlu0 %952 }
 0x13f   : > { %v3447_v29 = vpop.permute.xlu1 %946 }
 0x140   : > { %1584 = vrot.lane.b32.xlu0 %v3052_v9, %s2773_s17 }
 0x141   : > { %1456 = vrot.lane.b32.xlu1 %v2978_v41, %s2774_s3 }
 0x142   : > { %v3453_v12 = vpop.permute.xlu0 %956 }
 0x143   : > { %4261 = vst [vmem:[#allocation58_spill] sm:$0xff] %v3453_v12  ;;  %v3455_v6 = vpop.permute.xlu1 %950 }
 0x144   : > { %1204 = vrot.lane.b32.xlu0 %v3052_v9, %s2771_s30 }
 0x145   : > { %1458 = vrot.lane.b32.xlu1 %v2994_v46, %s2774_s3 }
 0x146   : > { %v3461_v32 = vpop.permute.xlu0 %960 }
 0x147   : > { %4262 = vst [vmem:[#allocation59_spill] sm:$0xff] %v3461_v32  ;;  %v3463_v1 = vpop.permute.xlu1 %954 }
 0x148   : > { %4263 = vst [vmem:[#allocation60_spill] sm:$0xff] %v3463_v1  ;;  %1206 = vrot.lane.b32.xlu0 %v3070_v14, %s2771_s30 }
 0x149   : > { %1078 = vrot.lane.b32.xlu1 %v2994_v46, %s2770_s29 }
 0x14a   : > { %v3469_v41 = vpop.permute.xlu0 %964 }
 0x14b   : > { %4264 = vst [vmem:[#allocation61_spill] sm:$0xff] %v3469_v41  ;;  %v3471_v12 = vpop.permute.xlu1 %958  ;;  %v586_v41 = vld [vmem:[#allocation2 + $0xa9] sm:$0xff] }
 0x14c   : > { %4265 = vst [vmem:[#allocation62_spill] sm:$0xff] %v3471_v12  ;;  %1334 = vrot.lane.b32.xlu0 %v3206_v59, %s2772_s8 }
 0x14d   : > { %1586 = vrot.lane.b32.xlu1 %v3070_v14, %s2773_s17 }
 0x14e   : > { %v3477_v9 = vpop.permute.xlu0 %968 }
 0x14f   : > { %4266 = vst [vmem:[#allocation63_spill] sm:$0xff] %v3477_v9  ;;  %v3479_v32 = vpop.permute.xlu1 %962  ;;  %v351_v9 = vld [vmem:[#allocation2] sm:$0xff] }
 0x150   : > { %4267 = vst [vmem:[#allocation64_spill] sm:$0xff] %v3479_v32  ;;  %1080 = vrot.lane.b32.xlu0 %v2986_v43, %s2770_s29 }
 0x151   : > { %1332 = vrot.lane.b32.xlu1 %v3178_v34, %s2772_s8 }
 0x152   : > { %v1059_v46 = vpop.permute.xlu0 %1058 }
 0x153   : > { %v3485_v1 = vpop.permute.xlu1 %966 }
 0x154   : > { %4268 = vst [vmem:[#allocation65_spill] sm:$0xff] %v3485_v1  ;;  %1588 = vrot.lane.b32.xlu0 %v3060_v11, %s2773_s17 }
 0x155   : > { %1460 = vrot.lane.b32.xlu1 %v586_v41, %s2774_s3  ;;  %v1664_v41 = vsel %vm318_vm2, %v351_v9, %v3096_v24 }
 0x156   : > { %v1187_v14 = vpop.permute.xlu0 %1186 }
 0x157   : > { %v1057_v12 = vpop.permute.xlu1 %1056 }
 0x158   : > { %1208 = vrot.lane.b32.xlu0 %v3060_v11, %s2771_s30  ;;  %v1697_v11 = vsel %vm1696_vm4, %v1664_v41, %v3254_v47 }
 0x159   : > { %1462 = vrot.lane.b32.xlu1 %v2999_v48, %s2774_s3  ;;  %v1730_v34 = vsel %vm1729_vm5, %v1697_v11, %v3397_v5 }
 0x15a   : > { %v1315_v43 = vpop.permute.xlu0 %1314  ;;  %v1763_v0 = vsel %vm1762_vm6, %v1730_v34, %v1057_v12 }
 0x15b   : > { %v1185_v32 = vpop.permute.xlu1 %1184 }
 0x15c   : > { %1210 = vrot.lane.b32.xlu0 %v3078_v16, %s2771_s30  ;;  %v1796_v24 = vsel %vm1795_vm7, %v1763_v0, %v1185_v32 }
 0x15d   : > { %1082 = vrot.lane.b32.xlu1 %v2999_v48, %s2770_s29  ;;  %v493_v48 = vld [vmem:[#allocation2 + $0xc1] sm:$0xff] }
 0x15e   : > { %v1061_v1 = vpop.permute.xlu0 %1060 }
 0x15f   : > { %v1313_v59 = vpop.permute.xlu1 %1312 }
 0x160   : > { %1338 = vrot.lane.b32.xlu0 %v3218_v55, %s2772_s8  ;;  %v1829_v9 = vsel %vm1828_vm9, %v1796_v24, %v1313_v59  ;;  %v352_v55 = vld [vmem:[#allocation2 + $0x8] sm:$0xff] }
 0x161   : > { %1590 = vrot.lane.b32.xlu1 %v3078_v16, %s2773_s17  ;;  %v1665_v59 = vsel %vm318_vm2, %v352_v55, %v3100_v33  ;;  %v495_v55 = vld [vmem:[#allocation2 + $0xd9] sm:$0xff] }
 0x162   : > { %v1569_v47 = vpop.permute.xlu0 %1568  ;;  %v1698_v32 = vsel %vm1696_vm4, %v1665_v59, %v3287_v17 }
 0x163   : > { %v1441_v5 = vpop.permute.xlu1 %1440  ;;  %v1731_v11 = vsel %vm1729_vm5, %v1698_v32, %v3415_v8 }
 0x164   : > { %v1862_v41 = vsel %vm1861_vm8, %v1829_v9, %v1441_v5  ;;  %1084 = vrot.lane.b32.xlu0 %v493_v48, %s2770_s29 }
 0x165   : > { %1336 = vrot.lane.b32.xlu1 %v3190_v52, %s2772_s8  ;;  %v1895_v16 = vsel %vm1894_vm10, %v1862_v41, %v1569_v47  ;;  %v589_v52 = vld [vmem:[#allocation2 + $0xc9] sm:$0xff]  ;;  %v1764_v47 = vsel %vm1762_vm6, %v1731_v11, %v1059_v46  ;;  %v591_v11 = vld [vmem:[#allocation2 + $0xe1] sm:$0xff] }
 0x166   : > { %2641 = vmatprep.mubr.msk.f32.mxu0 %vm1932_vm11, %v1895_v16  ;;  %v1189_v34 = vpop.permute.xlu0 %1188  ;;  %v1797_v9 = vsel %vm1795_vm7, %v1764_v47, %v1187_v14 }
 0x167   : > { %v1443_v0 = vpop.permute.xlu1 %1442  ;;  %v1830_v33 = vsel %vm1828_vm9, %v1797_v9, %v1315_v43 }
 0x168   : > { %1592 = vrot.lane.b32.xlu0 %v3068_v13, %s2773_s17  ;;  %v1863_v17 = vsel %vm1861_vm8, %v1830_v33, %v1443_v0 }
 0x169   : > { %1464 = vrot.lane.b32.xlu1 %v493_v48, %s2774_s3 }
 0x16a   : > { %v1191_v12 = vpop.permute.xlu0 %1190 }
 0x16b   : > { %v1063_v24 = vpop.permute.xlu1 %1062 }
 0x16c   : > { %1212 = vrot.lane.b32.xlu0 %v3068_v13, %s2771_s30  ;;  %v1666_v13 = vsel %vm318_vm2, %v3112_v49, %v3106_v40 }
 0x16d   : > { %1466 = vrot.lane.b32.xlu1 %v589_v52, %s2774_s3  ;;  %v1699_v46 = vsel %vm1696_vm4, %v1666_v13, %v3271_v27  ;;  %v497_v13 = vld [vmem:[#allocation2 + $0xf1] sm:$0xff] }
 0x16e   : > { %v1319_v48 = vpop.permute.xlu0 %1318  ;;  %v1732_v43 = vsel %vm1729_vm5, %v1699_v46, %v3405_v42 }
 0x16f   : > { %v1571_v5 = vpop.permute.xlu1 %1570  ;;  %v1765_v16 = vsel %vm1762_vm6, %v1732_v43, %v1061_v1 }
 0x170   : > { %v1896_v41 = vsel %vm1894_vm10, %v1863_v17, %v1571_v5  ;;  %1214 = vrot.lane.b32.xlu0 %v3084_v18, %s2771_s30  ;;  %v1798_v0 = vsel %vm1795_vm7, %v1765_v16, %v1189_v34  ;;  %v4269_v16 = vld [vmem:[#allocation12_spill] sm:$0xff] }
 0x171   : > { %1086 = vrot.lane.b32.xlu1 %v589_v52, %s2770_s29  ;;  %2642 = vmatmul.mubr.msk.f32.vlgmr.msra.gmra.mxu0 %vm1932_vm11, %v1896_v41 }
 0x172   : > { %v1065_v8 = vpop.permute.xlu0 %1064 }
 0x173   : > { %v1317_v14 = vpop.permute.xlu1 %1316 }
 0x174   : > { %1342 = vrot.lane.b32.xlu0 %v3230_v51, %s2772_s8  ;;  %v1831_v49 = vsel %vm1828_vm9, %v1798_v0, %v1317_v14 }
 0x175   : > { %1594 = vrot.lane.b32.xlu1 %v3084_v18, %s2773_s17  ;;  %v1667_v18 = vsel %vm318_vm2, %v3134_v58, %v3114_v50 }
 0x176   : > { %v1573_v40 = vpop.permute.xlu0 %1572  ;;  %v1700_v34 = vsel %vm1696_vm4, %v1667_v18, %v3295_v45 }
 0x177   : > { %v1445_v59 = vpop.permute.xlu1 %1444  ;;  %v1733_v32 = vsel %vm1729_vm5, %v1700_v34, %v3423_v39 }
 0x178   : > { %v1864_v27 = vsel %vm1861_vm8, %v1831_v49, %v1445_v59  ;;  %1088 = vrot.lane.b32.xlu0 %v495_v55, %s2770_s29 }
 0x179   : > { %1340 = vrot.lane.b32.xlu1 %v3202_v35, %s2772_s8  ;;  %v1897_v51 = vsel %vm1894_vm10, %v1864_v27, %v1573_v40  ;;  %v1766_v35 = vsel %vm1762_vm6, %v1733_v32, %v1063_v24  ;;  %v623_v24 = vld [vmem:[#allocation2 + $0xe2] sm:$0xff]  ;;  %v593_v27 = vld [vmem:[#allocation2 + $0xf9] sm:$0xff] }
 0x17a   : > { %2644 = vmatprep.mubr.msk.f32.mxu0 %vm1932_vm11, %v1897_v51  ;;  %v1193_v1 = vpop.permute.xlu0 %1192  ;;  %v1799_v50 = vsel %vm1795_vm7, %v1766_v35, %v1191_v12  ;;  %v4270_v32 = vld [vmem:[#allocation6_spill] sm:$0xff] }
 0x17b   : > { %v1447_v42 = vpop.permute.xlu1 %1446  ;;  %v1832_v45 = vsel %vm1828_vm9, %v1799_v50, %v1319_v48  ;;  %v1670_v35 = vsel %vm318_vm2, %v3130_v56, %v4270_v32 }
 0x17c   : > { %1596 = vrot.lane.b32.xlu0 %v3076_v15, %s2773_s17  ;;  %v1865_v39 = vsel %vm1861_vm8, %v1832_v45, %v1447_v42 }
 0x17d   : > { %1468 = vrot.lane.b32.xlu1 %v495_v55, %s2774_s3  ;;  %v1669_v55 = vsel %vm318_vm2, %v4269_v16, %v3123_v54 }
 0x17e   : > { %v1195_v52 = vpop.permute.xlu0 %1194  ;;  %v1702_v40 = vsel %vm1696_vm4, %v1669_v55, %v3303_v62 }
 0x17f   : > { %v1067_v47 = vpop.permute.xlu1 %1066 }
 0x180   : > { %1216 = vrot.lane.b32.xlu0 %v3076_v15, %s2771_s30  ;;  %v1668_v15 = vsel %vm318_vm2, %v3121_v53, %v3104_v36 }
 0x181   : > { %1470 = vrot.lane.b32.xlu1 %v591_v11, %s2774_s3  ;;  %v1701_v48 = vsel %vm1696_vm4, %v1668_v15, %v3285_v61 }
 0x182   : > { %v1323_v58 = vpop.permute.xlu0 %1322  ;;  %v1734_v5 = vsel %vm1729_vm5, %v1701_v48, %v3413_v10  ;;  %v316_v10 = vld [vmem:[%s2821_s22 + $0xf8] sm:$0xff]  ;;  %v594_v48 = vld [vmem:[#allocation2 + $0x109] sm:$0xff] }
 0x183   : > { %v1575_v9 = vpop.permute.xlu1 %1574  ;;  %v1767_v41 = vsel %vm1762_vm6, %v1734_v5, %v1065_v8  ;;  %v624_v8 = vld [vmem:[#allocation2 + $0xf2] sm:$0xff]  ;;  %350 = vst.msk [vmem:[#allocation2 + $0x189] sm:$0xff] %vm318_vm2, %v316_v10  ;;  %v626_v10 = vld [vmem:[#allocation2 + $0x10a] sm:$0xff] }
 0x184   : > { %v1898_v33 = vsel %vm1894_vm10, %v1865_v39, %v1575_v9  ;;  %1218 = vrot.lane.b32.xlu0 %v3089_v20, %s2771_s30  ;;  %v315_v20 = vld [vmem:[%s2821_s22 + $0xf0] sm:$0xff]  ;;  %v1800_v36 = vsel %vm1795_vm7, %v1767_v41, %v1193_v1  ;;  %v530_v1 = vld [vmem:[#allocation2 + $0xfa] sm:$0xff] }
 0x185   : > { %1090 = vrot.lane.b32.xlu1 %v591_v11, %s2770_s29  ;;  %2645 = vmatmul.mubr.msk.f32.gmra.mxu0 %vm1932_vm11, %v1898_v33  ;;  %349 = vst.msk [vmem:[#allocation2 + $0x181] sm:$0xff] %vm318_vm2, %v315_v20  ;;  %v3625_v11 = vld [vmem:[#allocation2 + $0x110] sm:$0xff] }
 0x186   : > { %v1069_v12 = vpop.permute.xlu0 %1068 }
 0x187   : > { %v1321_v17 = vpop.permute.xlu1 %1320 }
 0x188   : > { %1346 = vrot.lane.b32.xlu0 %v3240_v57, %s2772_s8  ;;  %v1833_v61 = vsel %vm1828_vm9, %v1800_v36, %v1321_v17  ;;  %v4272_v17 = vld [vmem:[#allocation9_spill] sm:$0xff] }
 0x189   : > { %1598 = vrot.lane.b32.xlu1 %v623_v24, %s2773_s17  ;;  %v595_v24 = vld [vmem:[#allocation2 + $0x111] sm:$0xff]  ;;  %v1671_v5 = vsel %vm318_vm2, %v3158_v19, %v4272_v17 }
 0x18a   : > { %v1577_v53 = vpop.permute.xlu0 %1576  ;;  %v1704_v41 = vsel %vm1696_vm4, %v1671_v5, %v3311_v4  ;;  %v627_v19 = vld [vmem:[#allocation2 + $0x112] sm:$0xff] }
 0x18b   : > { %v1449_v46 = vpop.permute.xlu1 %1448 }
 0x18c   : > { %v1866_v14 = vsel %vm1861_vm8, %v1833_v61, %v1449_v46  ;;  %1092 = vrot.lane.b32.xlu0 %v497_v13, %s2770_s29 }
 0x18d   : > { %1344 = vrot.lane.b32.xlu1 %v3214_v21, %s2772_s8  ;;  %v1899_v57 = vsel %vm1894_vm10, %v1866_v14, %v1577_v53  ;;  %v1735_v21 = vsel %vm1729_vm5, %v1702_v40, %v3431_v31 }
 0x18e   : > { %2647 = vmatprep.mubr.msk.f32.mxu0 %vm1932_vm11, %v1899_v57  ;;  %v1197_v43 = vpop.permute.xlu0 %1196  ;;  %v1768_v49 = vsel %vm1762_vm6, %v1735_v21, %v1067_v47  ;;  %v1703_v47 = vsel %vm1696_vm4, %v1670_v35, %v3293_v23  ;;  %v4271_v23 = vld [vmem:[#allocation29_spill] sm:$0xff] }
 0x18f   : > { %v1451_v0 = vpop.permute.xlu1 %1450  ;;  %v1801_v54 = vsel %vm1795_vm7, %v1768_v49, %v1195_v52  ;;  %v1736_v45 = vsel %vm1729_vm5, %v1703_v47, %v3421_v25  ;;  %v597_v35 = vld [vmem:[#allocation2 + $0x129] sm:$0xff] }
 0x190   : > { %1600 = vrot.lane.b32.xlu0 %v624_v8, %s2773_s17  ;;  %v1834_v62 = vsel %vm1828_vm9, %v1801_v54, %v1323_v58  ;;  %v1769_v58 = vsel %vm1762_vm6, %v1736_v45, %v1069_v12 }
 0x191   : > { %1472 = vrot.lane.b32.xlu1 %v497_v13, %s2774_s3  ;;  %v1867_v42 = vsel %vm1861_vm8, %v1834_v62, %v1451_v0  ;;  %v1802_v39 = vsel %vm1795_vm7, %v1769_v58, %v1197_v43  ;;  %v1737_v13 = vsel %vm1729_vm5, %v1704_v41, %v3439_v3  ;;  %v4273_v43 = vld [vmem:[#allocation7_spill] sm:$0xff] }
 0x192   : > { %v1199_v59 = vpop.permute.xlu0 %1198  ;;  %v1672_v16 = vsel %vm318_vm2, %v3142_v60, %v4273_v43  ;;  %v3666_v0 = vld [vmem:[#allocation2 + $0x120] sm:$0xff] }
 0x193   : > { %v1071_v51 = vpop.permute.xlu1 %1070  ;;  %v1705_v40 = vsel %vm1696_vm4, %v1672_v16, %v3301_v28 }
 0x194   : > { %1220 = vrot.lane.b32.xlu0 %v624_v8, %s2771_s30  ;;  %v1770_v36 = vsel %vm1762_vm6, %v1737_v13, %v1071_v51  ;;  %v1738_v49 = vsel %vm1729_vm5, %v1705_v40, %v3429_v37  ;;  %v3677_v51 = vld [vmem:[#allocation2 + $0x128] sm:$0xff] }
 0x195   : > { %1474 = vrot.lane.b32.xlu1 %v593_v27, %s2774_s3  ;;  %v1803_v46 = vsel %vm1795_vm7, %v1770_v36, %v1199_v59 }
 0x196   : > { %v1327_v18 = vpop.permute.xlu0 %1326 }
 0x197   : > { %v1579_v31 = vpop.permute.xlu1 %1578  ;;  %v1836_v4 = vsel %vm1828_vm9, %v1803_v46, %v1327_v18  ;;  %v4274_v18 = vld [vmem:[#allocation11_spill] sm:$0xff]  ;;  %v4277_v46 = vld [vmem:[#allocation14_spill] sm:$0xff] }
 0x198   : > { %v1900_v34 = vsel %vm1894_vm10, %v1867_v42, %v1579_v31  ;;  %1222 = vrot.lane.b32.xlu0 %v530_v1, %s2771_s30  ;;  %v1673_v42 = vsel %vm318_vm2, %v3170_v26, %v4274_v18 }
 0x199   : > { %1094 = vrot.lane.b32.xlu1 %v593_v27, %s2770_s29  ;;  %2648 = vmatmul.mubr.msk.f32.gmra.mxu0 %vm1932_vm11, %v1900_v34  ;;  %v1706_v34 = vsel %vm1696_vm4, %v1673_v42, %v3319_v63  ;;  %v631_v42 = vld [vmem:[#allocation2 + $0x142] sm:$0xff] }
 0x19a   : > { %v1073_v52 = vpop.permute.xlu0 %1072  ;;  %v1739_v32 = vsel %vm1729_vm5, %v1706_v34, %v3447_v29 }
 0x19b   : > { %v1325_v50 = vpop.permute.xlu1 %1324  ;;  %v1771_v59 = vsel %vm1762_vm6, %v1738_v49, %v1073_v52 }
 0x19c   : > { %1350 = vrot.lane.b32.xlu0 %v3625_v11, %s2772_s8  ;;  %v1835_v9 = vsel %vm1828_vm9, %v1802_v39, %v1325_v50  ;;  %v596_v50 = vld [vmem:[#allocation2 + $0x121] sm:$0xff] }
 0x19d   : > { %1602 = vrot.lane.b32.xlu1 %v530_v1, %s2773_s17 }
 0x19e   : > { %v1581_v56 = vpop.permute.xlu0 %1580 }
 0x19f   : > { %v1453_v33 = vpop.permute.xlu1 %1452 }
 0x1a0   : > { %v1868_v15 = vsel %vm1861_vm8, %v1835_v9, %v1453_v33  ;;  %970 = vrot.lane.b32.xlu0 %v3625_v11, %s2769_s28  ;;  %v629_v9 = vld [vmem:[#allocation2 + $0x12a] sm:$0xff]  ;;  %v4275_v33 = vld [vmem:[#allocation8_spill] sm:$0xff] }
 0x1a1   : > { %1348 = vrot.lane.b32.xlu1 %v4271_v23, %s2772_s8  ;;  %v1901_v25 = vsel %vm1894_vm10, %v1868_v15, %v1581_v56  ;;  %v1674_v15 = vsel %vm318_vm2, %v3154_v2, %v4275_v33  ;;  %v569_v33 = vld [vmem:[#allocation2 + $0x158] sm:$0xff] }
 0x1a2   : > { %2650 = vmatprep.mubr.msk.f32.mxu0 %vm1932_vm11, %v1901_v25  ;;  %v1201_v12 = vpop.permute.xlu0 %1200  ;;  %v628_v25 = vld [vmem:[#allocation2 + $0x122] sm:$0xff] }
 0x1a3   : > { %v1455_v20 = vpop.permute.xlu1 %1454  ;;  %v1804_v27 = vsel %vm1795_vm7, %v1771_v59, %v1201_v12 }
 0x1a4   : > { %1478 = vrot.lane.b32.xlu0 %v595_v24, %s2774_s3  ;;  %v1869_v57 = vsel %vm1861_vm8, %v1836_v4, %v1455_v20  ;;  %v566_v20 = vld [vmem:[#allocation2 + $0x138] sm:$0xff]  ;;  %v3727_v4 = vld [vmem:[#allocation2 + $0x140] sm:$0xff] }
 0x1a5   : > { %1476 = vrot.lane.b32.xlu1 %v594_v48, %s2774_s3 }
 0x1a6   : > { %v1203_v53 = vpop.permute.xlu0 %1202 }
 0x1a7   : > { %v1075_v61 = vpop.permute.xlu1 %1074 }
 0x1a8   : > { %1098 = vrot.lane.b32.xlu0 %v595_v24, %s2770_s29  ;;  %v1772_v52 = vsel %vm1762_vm6, %v1739_v32, %v1075_v61  ;;  %v4276_v24 = vld [vmem:[#allocation37_spill] sm:$0xff]  ;;  %v630_v32 = vld [vmem:[#allocation2 + $0x13a] sm:$0xff] }
 0x1a9   : > { %1096 = vrot.lane.b32.xlu1 %v594_v48, %s2770_s29  ;;  %v1805_v26 = vsel %vm1795_vm7, %v1772_v52, %v1203_v53  ;;  %v1707_v12 = vsel %vm1696_vm4, %v1674_v15, %v4276_v24 }
 0x1aa   : > { %v1331_v14 = vpop.permute.xlu0 %1330  ;;  %v1740_v17 = vsel %vm1729_vm5, %v1707_v12, %v3437_v7 }
 0x1ab   : > { %v1583_v3 = vpop.permute.xlu1 %1582  ;;  %v1838_v63 = vsel %vm1828_vm9, %v1805_v26, %v1331_v14  ;;  %v4281_v26 = vld [vmem:[#allocation22_spill] sm:$0xff] }
 0x1ac   : > { %v1902_v8 = vsel %vm1894_vm10, %v1869_v57, %v1583_v3  ;;  %1606 = vrot.lane.b32.xlu0 %v627_v19, %s2773_s17  ;;  %v472_v3 = vld [vmem:[#allocation2 + $0x140] sm:$0xff] }
 0x1ad   : > { %1604 = vrot.lane.b32.xlu1 %v626_v10, %s2773_s17  ;;  %2651 = vmatmul.mubr.msk.f32.gmra.mxu0 %vm1932_vm11, %v1902_v8 }
 0x1ae   : > { %v1077_v55 = vpop.permute.xlu0 %1076 }
 0x1af   : > { %v1329_v21 = vpop.permute.xlu1 %1328  ;;  %v1773_v5 = vsel %vm1762_vm6, %v1740_v17, %v1077_v55 }
 0x1b0   : > { %1352 = vrot.lane.b32.xlu0 %v3666_v0, %s2772_s8  ;;  %v1837_v54 = vsel %vm1828_vm9, %v1804_v27, %v1329_v21  ;;  %v598_v21 = vld [vmem:[#allocation2 + $0x139] sm:$0xff] }
 0x1b1   : > { %1224 = vrot.lane.b32.xlu1 %v626_v10, %s2771_s30  ;;  %v4278_v27 = vld [vmem:[#allocation10_spill] sm:$0xff] }
 0x1b2   : > { %v1585_v60 = vpop.permute.xlu0 %1584 }
 0x1b3   : > { %v1457_v1 = vpop.permute.xlu1 %1456 }
 0x1b4   : > { %v1870_v28 = vsel %vm1861_vm8, %v1837_v54, %v1457_v1  ;;  %1354 = vrot.lane.b32.xlu0 %v3677_v51, %s2772_s8  ;;  %v4279_v1 = vld [vmem:[#allocation38_spill] sm:$0xff] }
 0x1b5   : > { %1226 = vrot.lane.b32.xlu1 %v627_v19, %s2771_s30  ;;  %v1903_v37 = vsel %vm1894_vm10, %v1870_v28, %v1585_v60  ;;  %v1675_v19 = vsel %vm318_vm2, %v3182_v38, %v4277_v46  ;;  %v1676_v60 = vsel %vm318_vm2, %v3166_v22, %v4278_v27 }
 0x1b6   : > { %2653 = vmatprep.mubr.msk.f32.mxu0 %vm1932_vm11, %v1903_v37  ;;  %v1205_v62 = vpop.permute.xlu0 %1204  ;;  %v1708_v10 = vsel %vm1696_vm4, %v1675_v19, %v3327_v30  ;;  %v599_v30 = vld [vmem:[#allocation2 + $0x141] sm:$0xff]  ;;  %v1709_v28 = vsel %vm1696_vm4, %v1676_v60, %v4279_v1  ;;  %v4291_v1 = vld [vmem:[#allocation62_spill] sm:$0xff] }
 0x1b7   : > { %v1459_v31 = vpop.permute.xlu1 %1458  ;;  %v1806_v41 = vsel %vm1795_vm7, %v1773_v5, %v1205_v62  ;;  %v1741_v57 = vsel %vm1729_vm5, %v1708_v10, %v3455_v6  ;;  %v1742_v62 = vsel %vm1729_vm5, %v1709_v28, %v3445_v44  ;;  %v4290_v60 = vld [vmem:[#allocation43_spill] sm:$0xff] }
 0x1b8   : > { %974 = vrot.lane.b32.xlu0 %v3677_v51, %s2769_s28  ;;  %v1871_v29 = vsel %vm1861_vm8, %v1838_v63, %v1459_v31 }
 0x1b9   : > { %972 = vrot.lane.b32.xlu1 %v3666_v0, %s2769_s28 }
 0x1ba   : > { %v1207_v47 = vpop.permute.xlu0 %1206 }
 0x1bb   : > { %v1079_v45 = vpop.permute.xlu1 %1078 }
 0x1bc   : > { %1482 = vrot.lane.b32.xlu0 %v597_v35, %s2774_s3  ;;  %v1774_v8 = vsel %vm1762_vm6, %v1741_v57, %v1079_v45  ;;  %v4280_v45 = vld [vmem:[#allocation16_spill] sm:$0xff] }
 0x1bd   : > { %1480 = vrot.lane.b32.xlu1 %v596_v50, %s2774_s3  ;;  %v1807_v38 = vsel %vm1795_vm7, %v1774_v8, %v1207_v47  ;;  %v568_v47 = vld [vmem:[#allocation2 + $0x150] sm:$0xff]  ;;  %v1677_v63 = vsel %vm318_vm2, %v4281_v26, %v4280_v45 }
 0x1be   : > { %v1335_v58 = vpop.permute.xlu0 %1334 }
 0x1bf   : > { %v1587_v39 = vpop.permute.xlu1 %1586  ;;  %v1840_v55 = vsel %vm1828_vm9, %v1807_v38, %v1335_v58 }
 0x1c0   : > { %v1904_v56 = vsel %vm1894_vm10, %v1871_v29, %v1587_v39  ;;  %1102 = vrot.lane.b32.xlu0 %v597_v35, %s2770_s29  ;;  %v4282_v29 = vld [vmem:[#allocation41_spill] sm:$0xff] }
 0x1c1   : > { %1100 = vrot.lane.b32.xlu1 %v596_v50, %s2770_s29  ;;  %2654 = vmatmul.mubr.msk.f32.gmra.mxu0 %vm1932_vm11, %v1904_v56  ;;  %v1710_v39 = vsel %vm1696_vm4, %v1677_v63, %v4282_v29  ;;  %v4283_v56 = vld [vmem:[#allocation60_spill] sm:$0xff] }
 0x1c2   : > { %v1081_v23 = vpop.permute.xlu0 %1080  ;;  %v4293_v63 = vld [vmem:[#allocation40_spill] sm:$0xff] }
 0x1c3   : > { %v1333_v48 = vpop.permute.xlu1 %1332  ;;  %v1775_v18 = vsel %vm1762_vm6, %v1742_v62, %v1081_v23 }
 0x1c4   : > { %1610 = vrot.lane.b32.xlu0 %v629_v9, %s2773_s17  ;;  %v1839_v2 = vsel %vm1828_vm9, %v1806_v41, %v1333_v48  ;;  %v601_v41 = vld [vmem:[#allocation2 + $0x159] sm:$0xff] }
 0x1c5   : > { %1608 = vrot.lane.b32.xlu1 %v628_v25, %s2773_s17 }
 0x1c6   : > { %v1589_v13 = vpop.permute.xlu0 %1588 }
 0x1c7   : > { %v1461_v36 = vpop.permute.xlu1 %1460 }
 0x1c8   : > { %v1872_v53 = vsel %vm1861_vm8, %v1839_v2, %v1461_v36  ;;  %1356 = vrot.lane.b32.xlu0 %v566_v20, %s2772_s8  ;;  %v4285_v2 = vld [vmem:[#allocation18_spill] sm:$0xff] }
 0x1c9   : > { %1228 = vrot.lane.b32.xlu1 %v628_v25, %s2771_s30  ;;  %v1905_v7 = vsel %vm1894_vm10, %v1872_v53, %v1589_v13  ;;  %v4284_v13 = vld [vmem:[#allocation13_spill] sm:$0xff] }
 0x1ca   : > { %2656 = vmatprep.mubr.msk.f32.mxu0 %vm1932_vm11, %v1905_v7  ;;  %v1209_v61 = vpop.permute.xlu0 %1208  ;;  %v1678_v36 = vsel %vm318_vm2, %v4285_v2, %v4284_v13  ;;  %v600_v7 = vld [vmem:[#allocation2 + $0x151] sm:$0xff] }
 0x1cb   : > { %v1463_v14 = vpop.permute.xlu1 %1462  ;;  %v1808_v31 = vsel %vm1795_vm7, %v1775_v18, %v1209_v61  ;;  %v4286_v61 = vld [vmem:[#allocation39_spill] sm:$0xff] }
 0x1cc   : > { %1358 = vrot.lane.b32.xlu0 %v3727_v4, %s2772_s8  ;;  %v1873_v6 = vsel %vm1861_vm8, %v1840_v55, %v1463_v14  ;;  %v1711_v46 = vsel %vm1696_vm4, %v1678_v36, %v4286_v61  ;;  %v4287_v14 = vld [vmem:[#allocation58_spill] sm:$0xff]  ;;  %v633_v55 = vld [vmem:[#allocation2 + $0x15a] sm:$0xff]  ;;  %v4296_v36 = vld [vmem:[#allocation45_spill] sm:$0xff] }
 0x1cd   : > { %1230 = vrot.lane.b32.xlu1 %v629_v9, %s2771_s30  ;;  %v1743_v9 = vsel %vm1729_vm5, %v1710_v39, %v4283_v56  ;;  %v1744_v10 = vsel %vm1729_vm5, %v1711_v46, %v4287_v14  ;;  %v4294_v39 = vld [vmem:[#allocation59_spill] sm:$0xff]  ;;  %v635_v46 = vld [vmem:[#allocation2 + $0x172] sm:$0xff] }
 0x1ce   : > { %v1211_v43 = vpop.permute.xlu0 %1210 }
 0x1cf   : > { %v1083_v16 = vpop.permute.xlu1 %1082 }
 0x1d0   : > { %978 = vrot.lane.b32.xlu0 %v472_v3, %s2769_s28  ;;  %v1776_v15 = vsel %vm1762_vm6, %v1743_v9, %v1083_v16 }
 0x1d1   : > { %976 = vrot.lane.b32.xlu1 %v566_v20, %s2769_s28  ;;  %v1809_v24 = vsel %vm1795_vm7, %v1776_v15, %v1211_v43 }
 0x1d2   : > { %v1339_v40 = vpop.permute.xlu0 %1338 }
 0x1d3   : > { %v1591_v49 = vpop.permute.xlu1 %1590  ;;  %v1842_v12 = vsel %vm1828_vm9, %v1809_v24, %v1339_v40 }
 0x1d4   : > { %v1906_v59 = vsel %vm1894_vm10, %v1873_v6, %v1591_v49  ;;  %1486 = vrot.lane.b32.xlu0 %v599_v30, %s2774_s3  ;;  %v4288_v6 = vld [vmem:[#allocation19_spill] sm:$0xff]  ;;  %v4289_v49 = vld [vmem:[#allocation25_spill] sm:$0xff] }
 0x1d5   : > { %1484 = vrot.lane.b32.xlu1 %v598_v21, %s2774_s3  ;;  %2657 = vmatmul.mubr.msk.f32.gmra.mxu0 %vm1932_vm11, %v1906_v59  ;;  %v1679_v59 = vsel %vm318_vm2, %v4289_v49, %v4288_v6  ;;  %v2725_v49 = vld [vmem:[#allocation2 + $0xe0] sm:$0xff] }
 0x1d6   : > { %v1085_v54 = vpop.permute.xlu0 %1084 }
 0x1d7   : > { %v1337_v37 = vpop.permute.xlu1 %1336  ;;  %v1777_v57 = vsel %vm1762_vm6, %v1744_v10, %v1085_v54  ;;  %v1712_v54 = vsel %vm1696_vm4, %v1679_v59, %v4290_v60  ;;  %v634_v10 = vld [vmem:[#allocation2 + $0x16a] sm:$0xff]  ;;  %v4298_v59 = vld [vmem:[#allocation24_spill] sm:$0xff] }
 0x1d8   : > { %1106 = vrot.lane.b32.xlu0 %v599_v30, %s2770_s29  ;;  %v1841_v22 = vsel %vm1828_vm9, %v1808_v31, %v1337_v37  ;;  %v1745_v28 = vsel %vm1729_vm5, %v1712_v54, %v4291_v1  ;;  %v570_v37 = vld [vmem:[#allocation2 + $0x168] sm:$0xff]  ;;  %v4299_v54 = vld [vmem:[#allocation47_spill] sm:$0xff] }
 0x1d9   : > { %1104 = vrot.lane.b32.xlu1 %v598_v21, %s2770_s29  ;;  %v632_v21 = vld [vmem:[#allocation2 + $0x152] sm:$0xff] }
 0x1da   : > { %v1593_v34 = vpop.permute.xlu0 %1592 }
 0x1db   : > { %v1465_v35 = vpop.permute.xlu1 %1464 }
 0x1dc   : > { %v1874_v52 = vsel %vm1861_vm8, %v1841_v22, %v1465_v35  ;;  %1614 = vrot.lane.b32.xlu0 %v631_v42, %s2773_s17 }
 0x1dd   : > { %1612 = vrot.lane.b32.xlu1 %v630_v32, %s2773_s17  ;;  %v1907_v44 = vsel %vm1894_vm10, %v1874_v52, %v1593_v34  ;;  %v571_v34 = vld [vmem:[#allocation2 + $0x170] sm:$0xff] }
 0x1de   : > { %2659 = vmatprep.mubr.msk.f32.mxu0 %vm1932_vm11, %v1907_v44  ;;  %v1213_v50 = vpop.permute.xlu0 %1212 }
 0x1df   : > { %v1467_v58 = vpop.permute.xlu1 %1466  ;;  %v1810_v3 = vsel %vm1795_vm7, %v1777_v57, %v1213_v50  ;;  %v4292_v50 = vld [vmem:[#allocation15_spill] sm:$0xff] }
 0x1e0   : > { %1360 = vrot.lane.b32.xlu0 %v568_v47, %s2772_s8  ;;  %v1875_v17 = vsel %vm1861_vm8, %v1842_v12, %v1467_v58 }
 0x1e1   : > { %1232 = vrot.lane.b32.xlu1 %v630_v32, %s2771_s30 }
 0x1e2   : > { %v1215_v23 = vpop.permute.xlu0 %1214 }
 0x1e3   : > { %v1087_v25 = vpop.permute.xlu1 %1086 }
 0x1e4   : > { %1362 = vrot.lane.b32.xlu0 %v569_v33, %s2772_s8  ;;  %v1778_v62 = vsel %vm1762_vm6, %v1745_v28, %v1087_v25  ;;  %v602_v25 = vld [vmem:[#allocation2 + $0x169] sm:$0xff] }
 0x1e5   : > { %1234 = vrot.lane.b32.xlu1 %v631_v42, %s2771_s30  ;;  %v1811_v31 = vsel %vm1795_vm7, %v1778_v62, %v1215_v23 }
 0x1e6   : > { %v1343_v48 = vpop.permute.xlu0 %1342 }
 0x1e7   : > { %v1595_v5 = vpop.permute.xlu1 %1594  ;;  %v1844_v32 = vsel %vm1828_vm9, %v1811_v31, %v1343_v48 }
 0x1e8   : > { %v1908_v20 = vsel %vm1894_vm10, %v1875_v17, %v1595_v5  ;;  %982 = vrot.lane.b32.xlu0 %v569_v33, %s2769_s28  ;;  %v603_v33 = vld [vmem:[#allocation2 + $0x171] sm:$0xff] }
 0x1e9   : > { %980 = vrot.lane.b32.xlu1 %v568_v47, %s2769_s28  ;;  %2660 = vmatmul.mubr.msk.f32.gmra.mxu0 %vm1932_vm11, %v1908_v20  ;;  %v2723_v47 = vld [vmem:[#allocation2 + $0xc0] sm:$0xff]  ;;  %v2724_v20 = vld [vmem:[#allocation2 + $0xc8] sm:$0xff] }
 0x1ea   : > { %v1089_v53 = vpop.permute.xlu0 %1088  ;;  %v1680_v45 = vsel %vm318_vm2, %v2723_v47, %v4292_v50  ;;  %v4303_v47 = vld [vmem:[#allocation61_spill] sm:$0xff] }
 0x1eb   : > { %v1341_v19 = vpop.permute.xlu1 %1340  ;;  %v1713_v58 = vsel %vm1696_vm4, %v1680_v45, %v4293_v63 }
 0x1ec   : > { %1490 = vrot.lane.b32.xlu0 %v601_v41, %s2774_s3  ;;  %v1843_v43 = vsel %vm1828_vm9, %v1810_v3, %v1341_v19  ;;  %v1746_v56 = vsel %vm1729_vm5, %v1713_v58, %v4294_v39 }
 0x1ed   : > { %1488 = vrot.lane.b32.xlu1 %v600_v7, %s2774_s3  ;;  %v1779_v9 = vsel %vm1762_vm6, %v1746_v56, %v1089_v53 }
 0x1ee   : > { %v1597_v8 = vpop.permute.xlu0 %1596 }
 0x1ef   : > { %v1469_v16 = vpop.permute.xlu1 %1468 }
 0x1f0   : > { %v1876_v38 = vsel %vm1861_vm8, %v1843_v43, %v1469_v16  ;;  %1110 = vrot.lane.b32.xlu0 %v601_v41, %s2770_s29  ;;  %v4295_v41 = vld [vmem:[#allocation21_spill] sm:$0xff] }
 0x1f1   : > { %1108 = vrot.lane.b32.xlu1 %v600_v7, %s2770_s29  ;;  %v1909_v30 = vsel %vm1894_vm10, %v1876_v38, %v1597_v8  ;;  %v1681_v13 = vsel %vm318_vm2, %v2724_v20, %v4295_v41  ;;  %v4297_v7 = vld [vmem:[#allocation64_spill] sm:$0xff] }
 0x1f2   : > { %2662 = vmatprep.mubr.msk.f32.mxu0 %vm1932_vm11, %v1909_v30  ;;  %v1217_v40 = vpop.permute.xlu0 %1216  ;;  %v1714_v53 = vsel %vm1696_vm4, %v1681_v13, %v4296_v36  ;;  %v572_v8 = vld [vmem:[#allocation2 + $0x180] sm:$0xff] }
 0x1f3   : > { %v1471_v27 = vpop.permute.xlu1 %1470  ;;  %v1812_v15 = vsel %vm1795_vm7, %v1779_v9, %v1217_v40  ;;  %v1747_v61 = vsel %vm1729_vm5, %v1714_v53, %v4297_v7  ;;  %v573_v40 = vld [vmem:[#allocation2 + $0x188] sm:$0xff]  ;;  %v606_v13 = vld [vmem:[#allocation2 + $0x199] sm:$0xff] }
 0x1f4   : > { %1618 = vrot.lane.b32.xlu0 %v633_v55, %s2773_s17  ;;  %v1877_v35 = vsel %vm1861_vm8, %v1844_v32, %v1471_v27  ;;  %v1683_v27 = vsel %vm318_vm2, %v2725_v49, %v4298_v59  ;;  %v605_v32 = vld [vmem:[#allocation2 + $0x189] sm:$0xff]  ;;  %v638_v53 = vld [vmem:[#allocation2 + $0x19a] sm:$0xff] }
 0x1f5   : > { %1616 = vrot.lane.b32.xlu1 %v632_v21, %s2773_s17  ;;  %v1716_v1 = vsel %vm1696_vm4, %v1683_v27, %v4299_v54  ;;  %v2727_v7 = vld [vmem:[#allocation2 + $0xf8] sm:$0xff] }
 0x1f6   : > { %v1219_v18 = vpop.permute.xlu0 %1218 }
 0x1f7   : > { %v1091_v42 = vpop.permute.xlu1 %1090 }
 0x1f8   : > { %1364 = vrot.lane.b32.xlu0 %v570_v37, %s2772_s8  ;;  %v1780_v19 = vsel %vm1762_vm6, %v1747_v61, %v1091_v42  ;;  %v4301_v42 = vld [vmem:[#allocation17_spill] sm:$0xff]  ;;  %v4304_v61 = vld [vmem:[#allocation27_spill] sm:$0xff] }
 0x1f9   : > { %1236 = vrot.lane.b32.xlu1 %v632_v21, %s2771_s30  ;;  %v1813_v3 = vsel %vm1795_vm7, %v1780_v19, %v1219_v18  ;;  %v2726_v18 = vld [vmem:[#allocation2 + $0xd8] sm:$0xff] }
 0x1fa   : > { %v1347_v22 = vpop.permute.xlu0 %1346  ;;  %v1682_v31 = vsel %vm318_vm2, %v2726_v18, %v4301_v42 }
 0x1fb   : > { %v1599_v52 = vpop.permute.xlu1 %1598  ;;  %v1846_v43 = vsel %vm1828_vm9, %v1813_v3, %v1347_v22  ;;  %v4302_v22 = vld [vmem:[#allocation42_spill] sm:$0xff] }
 0x1fc   : > { %v1910_v44 = vsel %vm1894_vm10, %v1877_v35, %v1599_v52  ;;  %1366 = vrot.lane.b32.xlu0 %v571_v34, %s2772_s8  ;;  %v1715_v35 = vsel %vm1696_vm4, %v1682_v31, %v4302_v22 }
 0x1fd   : > { %1238 = vrot.lane.b32.xlu1 %v633_v55, %s2771_s30  ;;  %2663 = vmatmul.mubr.msk.f32.gmra.mxu0 %vm1932_vm11, %v1910_v44  ;;  %v604_v44 = vld [vmem:[#allocation2 + $0x181] sm:$0xff]  ;;  %v1748_v50 = vsel %vm1729_vm5, %v1715_v35, %v4303_v47 }
 0x1fe   : > { %v3820_v26 = vpop.permute.xlu0 %1092 }
 0x1ff   : > { %v1345_v29 = vpop.permute.xlu1 %1344  ;;  %v1781_v63 = vsel %vm1762_vm6, %v1748_v50, %v3820_v26  ;;  %v639_v50 = vld [vmem:[#allocation2 + $0x1a2] sm:$0xff] }
 0x200   : > { %986 = vrot.lane.b32.xlu0 %v571_v34, %s2769_s28  ;;  %v1845_v24 = vsel %vm1828_vm9, %v1812_v15, %v1345_v29 }
 0x201   : > { %984 = vrot.lane.b32.xlu1 %v570_v37, %s2769_s28  ;;  %v4300_v37 = vld [vmem:[#allocation65_spill] sm:$0xff] }
 0x202   : > { %v1601_v23 = vpop.permute.xlu0 %1600  ;;  %v1749_v62 = vsel %vm1729_vm5, %v1716_v1, %v4300_v37 }
 0x203   : > { %v1473_v12 = vpop.permute.xlu1 %1472 }
 0x204   : > { %v1878_v48 = vsel %vm1861_vm8, %v1845_v24, %v1473_v12  ;;  %1494 = vrot.lane.b32.xlu0 %v603_v33, %s2774_s3  ;;  %v637_v24 = vld [vmem:[#allocation2 + $0x18a] sm:$0xff] }
 0x205   : > { %1492 = vrot.lane.b32.xlu1 %v602_v25, %s2774_s3  ;;  %v1911_v17 = vsel %vm1894_vm10, %v1878_v48, %v1601_v23  ;;  %v636_v48 = vld [vmem:[#allocation2 + $0x182] sm:$0xff] }
 0x206   : > { %2665 = vmatprep.mubr.msk.f32.mxu1 %vm1932_vm11, %v1911_v17  ;;  %v1221_v5 = vpop.permute.xlu0 %1220 }
 0x207   : > { %v1475_v2 = vpop.permute.xlu1 %1474  ;;  %v1814_v29 = vsel %vm1795_vm7, %v1781_v63, %v1221_v5  ;;  %v574_v5 = vld [vmem:[#allocation2 + $0x198] sm:$0xff] }
 0x208   : > { %1114 = vrot.lane.b32.xlu0 %v603_v33, %s2770_s29  ;;  %v1879_v38 = vsel %vm1861_vm8, %v1846_v43, %v1475_v2 }
 0x209   : > { %1112 = vrot.lane.b32.xlu1 %v602_v25, %s2770_s29 }
 0x20a   : > { %v1223_v14 = vpop.permute.xlu0 %1222 }
 0x20b   : > { %v1095_v57 = vpop.permute.xlu1 %1094 }
 0x20c   : > { %1622 = vrot.lane.b32.xlu0 %v635_v46, %s2773_s17  ;;  %v1782_v34 = vsel %vm1762_vm6, %v1749_v62, %v1095_v57  ;;  %v4305_v57 = vld [vmem:[#allocation20_spill] sm:$0xff] }
 0x20d   : > { %1620 = vrot.lane.b32.xlu1 %v634_v10, %s2773_s17  ;;  %v1815_v58 = vsel %vm1795_vm7, %v1782_v34, %v1223_v14  ;;  %v575_v14 = vld [vmem:[#allocation2 + $0x1a0] sm:$0xff] }
 0x20e   : > { %v1351_v16 = vpop.permute.xlu0 %1350 }
 0x20f   : > { %v1603_v30 = vpop.permute.xlu1 %1602  ;;  %v1848_v39 = vsel %vm1828_vm9, %v1815_v58, %v1351_v16 }
 0x210   : > { %v1912_v55 = vsel %vm1894_vm10, %v1879_v38, %v1603_v30  ;;  %1368 = vrot.lane.b32.xlu0 %v572_v8, %s2772_s8  ;;  %v4307_v38 = vld [vmem:[#allocation44_spill] sm:$0xff] }
 0x211   : > { %1240 = vrot.lane.b32.xlu1 %v634_v10, %s2771_s30  ;;  %2666 = vmatmul.mubr.msk.f32.vlgmr.msra.gmra.mxu1 %vm1932_vm11, %v1912_v55  ;;  %v2728_v10 = vld [vmem:[#allocation2 + $0xf0] sm:$0xff] }
 0x212   : > { %v3854_v21 = vpop.permute.xlu0 %970  ;;  %v1684_v3 = vsel %vm318_vm2, %v2728_v10, %v4305_v57 }
 0x213   : > { %v1349_v6 = vpop.permute.xlu1 %1348  ;;  %v1717_v30 = vsel %vm1696_vm4, %v1684_v3, %v4307_v38 }
 0x214   : > { %1370 = vrot.lane.b32.xlu0 %v573_v40, %s2772_s8  ;;  %v1847_v56 = vsel %vm1828_vm9, %v1814_v29, %v1349_v6 }
 0x215   : > { %1242 = vrot.lane.b32.xlu1 %v635_v46, %s2771_s30  ;;  %v1685_v46 = vsel %vm318_vm2, %v2727_v7, %v4304_v61 }
 0x216   : > { %v1479_v60 = vpop.permute.xlu0 %1478 }
 0x217   : > { %v1477_v28 = vpop.permute.xlu1 %1476  ;;  %v1881_v9 = vsel %vm1861_vm8, %v1848_v39, %v1479_v60 }
 0x218   : > { %990 = vrot.lane.b32.xlu0 %v573_v40, %s2769_s28  ;;  %v1880_v15 = vsel %vm1861_vm8, %v1847_v56, %v1477_v28  ;;  %v4308_v40 = vld [vmem:[#allocation63_spill] sm:$0xff] }
 0x219   : > { %988 = vrot.lane.b32.xlu1 %v572_v8, %s2769_s28  ;;  %v4306_v8 = vld [vmem:[#allocation49_spill] sm:$0xff]  ;;  %v1750_v6 = vsel %vm1729_vm5, %v1717_v30, %v4308_v40 }
 0x21a   : > { %v1099_v52 = vpop.permute.xlu0 %1098  ;;  %v1718_v43 = vsel %vm1696_vm4, %v1685_v46, %v4306_v8 }
 0x21b   : > { %v1097_v45 = vpop.permute.xlu1 %1096  ;;  %v1751_v55 = vsel %vm1729_vm5, %v1718_v43, %v3854_v21  ;;  %v607_v21 = vld [vmem:[#allocation2 + $0x1a1] sm:$0xff] }
 0x21c   : > { %1498 = vrot.lane.b32.xlu0 %v605_v32, %s2774_s3  ;;  %v1784_v49 = vsel %vm1762_vm6, %v1751_v55, %v1099_v52  ;;  %v1783_v27 = vsel %vm1762_vm6, %v1750_v6, %v1097_v45 }
 0x21d   : > { %1496 = vrot.lane.b32.xlu1 %v604_v44, %s2774_s3 }
 0x21e   : > { %v1607_v33 = vpop.permute.xlu0 %1606 }
 0x21f   : > { %v1914_v23 = vsel %vm1894_vm10, %v1881_v9, %v1607_v33  ;;  %v1605_v26 = vpop.permute.xlu1 %1604 }
 0x220   : > { %v1913_v25 = vsel %vm1894_vm10, %v1880_v15, %v1605_v26  ;;  %1118 = vrot.lane.b32.xlu0 %v605_v32, %s2770_s29 }
 0x221   : > { %1116 = vrot.lane.b32.xlu1 %v604_v44, %s2770_s29  ;;  %2668 = vmatprep.mubr.msk.f32.mxu1 %vm1932_vm11, %v1913_v25 }
 0x222   : > { %2669 = vmatmul.mubr.msk.f32.gmra.mxu1 %vm1932_vm11, %v1914_v23  ;;  %v1353_v12 = vpop.permute.xlu0 %1352 }
 0x223   : > { %v1225_v17 = vpop.permute.xlu1 %1224 }
 0x224   : > { %1626 = vrot.lane.b32.xlu0 %v637_v24, %s2773_s17  ;;  %v1816_v28 = vsel %vm1795_vm7, %v1783_v27, %v1225_v17  ;;  %v4310_v17 = vld [vmem:[#allocation30_spill] sm:$0xff] }
 0x225   : > { %1624 = vrot.lane.b32.xlu1 %v636_v48, %s2773_s17  ;;  %v1849_v35 = vsel %vm1828_vm9, %v1816_v28, %v1353_v12  ;;  %v4309_v12 = vld [vmem:[#allocation23_spill] sm:$0xff] }
 0x226   : > { %v1355_v20 = vpop.permute.xlu0 %1354 }
 0x227   : > { %v1227_v41 = vpop.permute.xlu1 %1226 }
 0x228   : > { %1372 = vrot.lane.b32.xlu0 %v574_v5, %s2772_s8  ;;  %v1817_v60 = vsel %vm1795_vm7, %v1784_v49, %v1227_v41  ;;  %v1687_v5 = vsel %vm318_vm2, %v3625_v11, %v4310_v17  ;;  %v4311_v41 = vld [vmem:[#allocation46_spill] sm:$0xff]  ;;  %v4316_v17 = vld [vmem:[#allocation48_spill] sm:$0xff] }
 0x229   : > { %1244 = vrot.lane.b32.xlu1 %v636_v48, %s2771_s30  ;;  %v1850_v34 = vsel %vm1828_vm9, %v1817_v60, %v1355_v20 }
 0x22a   : > { %v3893_v2 = vpop.permute.xlu0 %974 }
 0x22b   : > { %v3895_v36 = vpop.permute.xlu1 %972 }
 0x22c   : > { %1500 = vrot.lane.b32.xlu0 %v606_v13, %s2774_s3 }
 0x22d   : > { %1246 = vrot.lane.b32.xlu1 %v637_v24, %s2771_s30  ;;  %v2729_v24 = vld [vmem:[#allocation2 + $0x108] sm:$0xff] }
 0x22e   : > { %v1483_v19 = vpop.permute.xlu0 %1482  ;;  %v1686_v48 = vsel %vm318_vm2, %v2729_v24, %v4309_v12 }
 0x22f   : > { %v1481_v16 = vpop.permute.xlu1 %1480  ;;  %v1883_v22 = vsel %vm1861_vm8, %v1850_v34, %v1483_v19  ;;  %v1719_v13 = vsel %vm1696_vm4, %v1686_v48, %v4311_v41 }
 0x230   : > { %1628 = vrot.lane.b32.xlu0 %v638_v53, %s2773_s17  ;;  %v1882_v45 = vsel %vm1861_vm8, %v1849_v35, %v1481_v16  ;;  %v4312_v53 = vld [vmem:[#allocation51_spill] sm:$0xff]  ;;  %v1752_v11 = vsel %vm1729_vm5, %v1719_v13, %v3895_v36 }
 0x231   : > { %v2643_v59 = vpop.f32.mrf.mxu0  ;;  %1374 = vrot.lane.b32.xlu1 %v575_v14, %s2772_s8  ;;  %v1720_v7 = vsel %vm1696_vm4, %v1687_v5, %v4312_v53 }
 0x232   : > { %v2329_v54 = vmul.f32 %v2643_v59, %v2643_v59  ;;  %2435 = vst.msk [vmem:[%s2826_s25 + $0x8] sm:$0xff] %vm318_vm2, %v2643_v59  ;;  %v1103_v1 = vpop.permute.xlu0 %1102  ;;  %v2260_v18 = vsel %vm318_vm2, %v2643_v59, 0.0  ;;  %v1753_v19 = vsel %vm1729_vm5, %v1720_v7, %v3893_v2 }
 0x233   : > { %v2099_v37 = vpop.f32.mrf.mxu0  ;;  %v1101_v62 = vpop.permute.xlu1 %1100  ;;  %v1786_v3 = vsel %vm1762_vm6, %v1753_v19, %v1103_v1 }
 0x234   : > { %v2259_v42 = vsel %vm318_vm2, %v2099_v37, 0.0  ;;  %v2328_v31 = vmul.f32 %v2099_v37, %v2099_v37  ;;  %2434 = vst.msk [vmem:[%s2826_s25] sm:$0xff] %vm318_vm2, %v2099_v37  ;;  %v2361_v52 = vsel %vm318_vm2, %v2329_v54, 0.0  ;;  %v1785_v43 = vsel %vm1762_vm6, %v1752_v11, %v1101_v62 }
 0x235   : > { %v2261_v32 = vadd.f32 %v2260_v18, %v2259_v42  ;;  %1502 = vrot.lane.b32.xlu1 %v607_v21, %s2774_s3 }
 0x236   : > { %v2360_v44 = vsel %vm318_vm2, %v2328_v31, 0.0  ;;  %v1611_v47 = vpop.permute.xlu0 %1610 }
 0x237   : > { %v2362_v63 = vadd.f32 %v2361_v52, %v2360_v44  ;;  %v1916_v58 = vsel %vm1894_vm10, %v1883_v22, %v1611_v47  ;;  %v1609_v29 = vpop.permute.xlu1 %1608 }
 0x238   : > { %v1915_v39 = vsel %vm1894_vm10, %v1882_v45, %v1609_v29 }
 0x239   : > { %1630 = vrot.lane.b32.xlu1 %v639_v50, %s2773_s17  ;;  %2671 = vmatprep.mubr.msk.f32.mxu1 %vm1932_vm11, %v1915_v39 }
 0x23a   : > { %2672 = vmatmul.mubr.msk.f32.gmra.mxu1 %vm1932_vm11, %v1916_v58  ;;  %v1357_v56 = vpop.permute.xlu0 %1356 }
 0x23b   : > { %v1229_v9 = vpop.permute.xlu1 %1228 }
 0x23c   : > { %v1818_v55 = vsel %vm1795_vm7, %v1785_v43, %v1229_v9  ;;  %v4314_v9 = vld [vmem:[#allocation26_spill] sm:$0xff] }
 0x23d   : > { %v1851_v54 = vsel %vm1828_vm9, %v1818_v55, %v1357_v56 }
 0x23e   : > { %v1359_v33 = vpop.permute.xlu0 %1358 }
 0x23f   : > { %v1231_v15 = vpop.permute.xlu1 %1230 }
 0x240   : > { %v1819_v16 = vsel %vm1795_vm7, %v1786_v3, %v1231_v15  ;;  %v4315_v15 = vld [vmem:[#allocation53_spill] sm:$0xff] }
 0x241   : > { %v1852_v36 = vsel %vm1828_vm9, %v1819_v16, %v1359_v33  ;;  %v1688_v33 = vsel %vm318_vm2, %v3666_v0, %v4314_v9 }
 0x242   : > { %v3935_v23 = vpop.permute.xlu0 %978  ;;  %v1721_v5 = vsel %vm1696_vm4, %v1688_v33, %v4316_v17 }
 0x243   : > { %v3937_v26 = vpop.permute.xlu1 %976 }
 0x244   : > { %v1754_v41 = vsel %vm1729_vm5, %v1721_v5, %v3937_v26 }
 0x245   : > { %v2646_v25 = vpop.f32.mrf.mxu0 }
 0x246   : > { %2437 = vst.msk [vmem:[%s2826_s25 + $0x18] sm:$0xff] %vm318_vm2, %v2646_v25  ;;  %v1487_v20 = vpop.permute.xlu0 %1486  ;;  %v2331_v14 = vmul.f32 %v2646_v25, %v2646_v25  ;;  %v2264_v38 = vsel %vm318_vm2, %v2646_v25, 0.0 }
 0x247   : > { %v1485_v61 = vpop.permute.xlu1 %1484  ;;  %v2109_v46 = vpop.f32.mrf.mxu0  ;;  %v1885_v60 = vsel %vm1861_vm8, %v1852_v36, %v1487_v20 }
 0x248   : > { %v2262_v10 = vsel %vm318_vm2, %v2109_v46, 0.0  ;;  %v2330_v57 = vmul.f32 %v2109_v46, %v2109_v46  ;;  %2436 = vst.msk [vmem:[%s2826_s25 + $0x10] sm:$0xff] %vm318_vm2, %v2109_v46  ;;  %v2365_v59 = vsel %vm318_vm2, %v2331_v14, 0.0  ;;  %v1884_v21 = vsel %vm1861_vm8, %v1851_v54, %v1485_v61 }
 0x249   : > { %v2263_v8 = vadd.f32 %v2262_v10, %v2261_v32 }
 0x24a   : > { %v2363_v2 = vsel %vm318_vm2, %v2330_v57, 0.0  ;;  %v1107_v30 = vpop.permute.xlu0 %1106 }
 0x24b   : > { %v2364_v40 = vadd.f32 %v2363_v2, %v2362_v63  ;;  %v1105_v6 = vpop.permute.xlu1 %1104  ;;  %v2265_v49 = vadd.f32 %v2264_v38, %v2263_v8  ;;  %v4313_v63 = vld [vmem:[#allocation32_spill] sm:$0xff] }
 0x24c   : > { %v1689_v58 = vsel %vm318_vm2, %v3677_v51, %v4313_v63  ;;  %v1787_v53 = vsel %vm1762_vm6, %v1754_v41, %v1105_v6 }
 0x24d   : > { %v2366_v27 = vadd.f32 %v2365_v59, %v2364_v40  ;;  %v1722_v25 = vsel %vm1696_vm4, %v1689_v58, %v4315_v15 }
 0x24e   : > { %v1615_v1 = vpop.permute.xlu0 %1614  ;;  %v1755_v51 = vsel %vm1729_vm5, %v1722_v25, %v3935_v23 }
 0x24f   : > { %v1918_v28 = vsel %vm1894_vm10, %v1885_v60, %v1615_v1  ;;  %v1613_v37 = vpop.permute.xlu1 %1612  ;;  %v1788_v13 = vsel %vm1762_vm6, %v1755_v51, %v1107_v30 }
 0x250   : > { %v1917_v62 = vsel %vm1894_vm10, %v1884_v21, %v1613_v37 }
 0x251   : > { %2674 = vmatprep.mubr.msk.f32.mxu1 %vm1932_vm11, %v1917_v62 }
 0x252   : > { %2675 = vmatmul.mubr.msk.f32.gmra.mxu1 %vm1932_vm11, %v1918_v28  ;;  %v1361_v18 = vpop.permute.xlu0 %1360  ;;  %v377_v28 = vld [vmem:[#allocation2 + $0x138] sm:$0xff] }
 0x253   : > { %v1233_v42 = vpop.permute.xlu1 %1232 }
 0x254   : > { %v1820_v46 = vsel %vm1795_vm7, %v1787_v53, %v1233_v42 }
 0x255   : > { %v1853_v10 = vsel %vm1828_vm9, %v1820_v46, %v1361_v18  ;;  %v4317_v18 = vld [vmem:[#allocation34_spill] sm:$0xff] }
 0x256   : > { %v1363_v31 = vpop.permute.xlu0 %1362  ;;  %v1691_v42 = vsel %vm318_vm2, %v3727_v4, %v4317_v18 }
 0x257   : > { %v1235_v34 = vpop.permute.xlu1 %1234 }
 0x258   : > { %v1821_v7 = vsel %vm1795_vm7, %v1788_v13, %v1235_v34  ;;  %v4318_v34 = vld [vmem:[#allocation28_spill] sm:$0xff] }
 0x259   : > { %v2649_v32 = vpop.f32.mrf.mxu0  ;;  %v1854_v14 = vsel %vm1828_vm9, %v1821_v7, %v1363_v31 }
 0x25a   : > { %2439 = vst.msk [vmem:[%s2826_s25 + $0x28] sm:$0xff] %vm318_vm2, %v2649_v32  ;;  %v3974_v22 = vpop.permute.xlu0 %982  ;;  %v2333_v44 = vmul.f32 %v2649_v32, %v2649_v32  ;;  %v2268_v29 = vsel %vm318_vm2, %v2649_v32, 0.0  ;;  %v1690_v32 = vsel %vm318_vm2, %v377_v28, %v4318_v34 }
 0x25b   : > { %v3976_v35 = vpop.permute.xlu1 %980  ;;  %v2119_v52 = vpop.f32.mrf.mxu0 }
 0x25c   : > { %v2266_v47 = vsel %vm318_vm2, %v2119_v52, 0.0  ;;  %v2332_v50 = vmul.f32 %v2119_v52, %v2119_v52  ;;  %2438 = vst.msk [vmem:[%s2826_s25 + $0x20] sm:$0xff] %vm318_vm2, %v2119_v52  ;;  %v2369_v20 = vsel %vm318_vm2, %v2333_v44, 0.0  ;;  %v4319_v52 = vld [vmem:[#allocation55_spill] sm:$0xff] }
 0x25d   : > { %v2267_v45 = vadd.f32 %v2266_v47, %v2265_v49  ;;  %v1724_v44 = vsel %vm1696_vm4, %v1691_v42, %v4319_v52  ;;  %v381_v52 = vld [vmem:[#allocation2 + $0x168] sm:$0xff] }
 0x25e   : > { %v2367_v39 = vsel %vm318_vm2, %v2332_v50, 0.0  ;;  %v1491_v56 = vpop.permute.xlu0 %1490  ;;  %v4320_v50 = vld [vmem:[#allocation50_spill] sm:$0xff]  ;;  %v1757_v63 = vsel %vm1729_vm5, %v1724_v44, %v3974_v22 }
 0x25f   : > { %v2368_v24 = vadd.f32 %v2367_v39, %v2366_v27  ;;  %v1489_v12 = vpop.permute.xlu1 %1488  ;;  %v2269_v48 = vadd.f32 %v2268_v29, %v2267_v45  ;;  %v1887_v23 = vsel %vm1861_vm8, %v1854_v14, %v1491_v56  ;;  %v1723_v45 = vsel %vm1696_vm4, %v1690_v32, %v4320_v50 }
 0x260   : > { %v1886_v26 = vsel %vm1861_vm8, %v1853_v10, %v1489_v12  ;;  %v1756_v58 = vsel %vm1729_vm5, %v1723_v45, %v3976_v35 }
 0x261   : > { %v2370_v0 = vadd.f32 %v2369_v20, %v2368_v24 }
 0x262   : > { %v1111_v61 = vpop.permute.xlu0 %1110 }
 0x263   : > { %v1109_v19 = vpop.permute.xlu1 %1108  ;;  %v1790_v29 = vsel %vm1762_vm6, %v1757_v63, %v1111_v61 }
 0x264   : > { %v1789_v4 = vsel %vm1762_vm6, %v1756_v58, %v1109_v19 }
 0x266   : > { %v1619_v57 = vpop.permute.xlu0 %1618 }
 0x267   : > { %v1920_v11 = vsel %vm1894_vm10, %v1887_v23, %v1619_v57  ;;  %v1617_v3 = vpop.permute.xlu1 %1616 }
 0x268   : > { %v1919_v8 = vsel %vm1894_vm10, %v1886_v26, %v1617_v3  ;;  %v380_v3 = vld [vmem:[#allocation2 + $0x158] sm:$0xff] }
 0x269   : > { %2677 = vmatprep.mubr.msk.f32.mxu1 %vm1932_vm11, %v1919_v8 }
 0x26a   : > { %2678 = vmatmul.mubr.msk.f32.gmra.mxu1 %vm1932_vm11, %v1920_v11  ;;  %v1365_v43 = vpop.permute.xlu0 %1364 }
 0x26b   : > { %v1237_v16 = vpop.permute.xlu1 %1236 }
 0x26c   : > { %v1822_v9 = vsel %vm1795_vm7, %v1789_v4, %v1237_v16  ;;  %v4321_v16 = vld [vmem:[#allocation35_spill] sm:$0xff] }
 0x26d   : > { %v2652_v38 = vpop.f32.mrf.mxu0  ;;  %v1855_v22 = vsel %vm1828_vm9, %v1822_v9, %v1365_v43  ;;  %v379_v43 = vld [vmem:[#allocation2 + $0x150] sm:$0xff] }
 0x26e   : > { %2441 = vst.msk [vmem:[%s2826_s25 + $0x38] sm:$0xff] %vm318_vm2, %v2652_v38  ;;  %v1367_v2 = vpop.permute.xlu0 %1366  ;;  %v2335_v40 = vmul.f32 %v2652_v38, %v2652_v38  ;;  %v2272_v36 = vsel %vm318_vm2, %v2652_v38, 0.0  ;;  %v1693_v38 = vsel %vm318_vm2, %v380_v3, %v4321_v16 }
 0x26f   : > { %v1239_v30 = vpop.permute.xlu1 %1238  ;;  %v2129_v55 = vpop.f32.mrf.mxu0 }
 0x270   : > { %v2270_v6 = vsel %vm318_vm2, %v2129_v55, 0.0  ;;  %v2334_v49 = vmul.f32 %v2129_v55, %v2129_v55  ;;  %2440 = vst.msk [vmem:[%s2826_s25 + $0x30] sm:$0xff] %vm318_vm2, %v2129_v55  ;;  %v2373_v37 = vsel %vm318_vm2, %v2335_v40, 0.0  ;;  %v1823_v39 = vsel %vm1795_vm7, %v1790_v29, %v1239_v30  ;;  %v4322_v30 = vld [vmem:[#allocation31_spill] sm:$0xff]  ;;  %v4323_v40 = vld [vmem:[#allocation56_spill] sm:$0xff] }
 0x271   : > { %v2271_v59 = vadd.f32 %v2270_v6, %v2269_v48  ;;  %v1856_v15 = vsel %vm1828_vm9, %v1823_v39, %v1367_v2  ;;  %v1692_v55 = vsel %vm318_vm2, %v379_v43, %v4322_v30  ;;  %v1726_v6 = vsel %vm1696_vm4, %v1693_v38, %v4323_v40 }
 0x272   : > { %v2371_v27 = vsel %vm318_vm2, %v2334_v49, 0.0  ;;  %v987_v60 = vpop.permute.xlu0 %986 }
 0x273   : > { %v2372_v54 = vadd.f32 %v2371_v27, %v2370_v0  ;;  %v985_v1 = vpop.permute.xlu1 %984  ;;  %v2273_v21 = vadd.f32 %v2272_v36, %v2271_v59  ;;  %v4324_v59 = vld [vmem:[#allocation52_spill] sm:$0xff]  ;;  %v1759_v27 = vsel %vm1729_vm5, %v1726_v6, %v987_v60 }
 0x274   : > { %v1725_v36 = vsel %vm1696_vm4, %v1692_v55, %v4324_v59 }
 0x275   : > { %v2374_v62 = vadd.f32 %v2373_v37, %v2372_v54  ;;  %v1758_v54 = vsel %vm1729_vm5, %v1725_v36, %v985_v1 }
 0x276   : > { %v1495_v31 = vpop.permute.xlu0 %1494 }
 0x277   : > { %v1493_v47 = vpop.permute.xlu1 %1492  ;;  %v1889_v25 = vsel %vm1861_vm8, %v1856_v15, %v1495_v31 }
 0x278   : > { %v1888_v35 = vsel %vm1861_vm8, %v1855_v22, %v1493_v47  ;;  %v4326_v22 = vld [vmem:[#allocation54_spill] sm:$0xff] }
 0x27a   : > { %v1115_v56 = vpop.permute.xlu0 %1114 }
 0x27b   : > { %v1113_v33 = vpop.permute.xlu1 %1112 }
 0x27c   : > { %v1791_v28 = vsel %vm1762_vm6, %v1758_v54, %v1113_v33 }
 0x27e   : > { %v1623_v24 = vpop.permute.xlu0 %1622 }
 0x27f   : > { %v1922_v12 = vsel %vm1894_vm10, %v1889_v25, %v1623_v24  ;;  %v1621_v48 = vpop.permute.xlu1 %1620 }
 0x280   : > { %v1921_v17 = vsel %vm1894_vm10, %v1888_v35, %v1621_v48 }
 0x281   : > { %v2655_v5 = vpop.f32.mrf.mxu0  ;;  %2680 = vmatprep.mubr.msk.f32.mxu1 %vm1932_vm11, %v1921_v17 }
 0x282   : > { %2443 = vst.msk [vmem:[%s2826_s25 + $0x48] sm:$0xff] %vm318_vm2, %v2655_v5  ;;  %2681 = vmatmul.mubr.msk.f32.gmra.mxu1 %vm1932_vm11, %v1922_v12  ;;  %v1369_v51 = vpop.permute.xlu0 %1368  ;;  %v2337_v13 = vmul.f32 %v2655_v5, %v2655_v5  ;;  %v2276_v61 = vsel %vm318_vm2, %v2655_v5, 0.0 }
 0x283   : > { %v1241_v20 = vpop.permute.xlu1 %1240  ;;  %v2139_v41 = vpop.f32.mrf.mxu0 }
 0x284   : > { %v2274_v0 = vsel %vm318_vm2, %v2139_v41, 0.0  ;;  %v2336_v53 = vmul.f32 %v2139_v41, %v2139_v41  ;;  %2442 = vst.msk [vmem:[%s2826_s25 + $0x40] sm:$0xff] %vm318_vm2, %v2139_v41  ;;  %v2377_v57 = vsel %vm318_vm2, %v2337_v13, 0.0  ;;  %v1824_v18 = vsel %vm1795_vm7, %v1791_v28, %v1241_v20 }
 0x285   : > { %v2275_v7 = vadd.f32 %v2274_v0, %v2273_v21  ;;  %v1792_v21 = vsel %vm1762_vm6, %v1759_v27, %v1115_v56  ;;  %v1857_v60 = vsel %vm1828_vm9, %v1824_v18, %v1369_v51  ;;  %v4325_v56 = vld [vmem:[#allocation33_spill] sm:$0xff] }
 0x286   : > { %v2375_v46 = vsel %vm318_vm2, %v2336_v53, 0.0  ;;  %v1371_v19 = vpop.permute.xlu0 %1370  ;;  %v1694_v9 = vsel %vm318_vm2, %v381_v52, %v4325_v56 }
 0x287   : > { %v2376_v14 = vadd.f32 %v2375_v46, %v2374_v62  ;;  %v1243_v23 = vpop.permute.xlu1 %1242  ;;  %v2277_v10 = vadd.f32 %v2276_v61, %v2275_v7  ;;  %v1727_v24 = vsel %vm1696_vm4, %v1694_v9, %v4326_v22  ;;  %v382_v7 = vld [vmem:[#allocation2 + $0x170] sm:$0xff] }
 0x288   : > { %v1825_v37 = vsel %vm1795_vm7, %v1792_v21, %v1243_v23  ;;  %v4327_v23 = vld [vmem:[#allocation36_spill] sm:$0xff] }
 0x289   : > { %v2378_v26 = vadd.f32 %v2377_v57, %v2376_v14  ;;  %v1858_v31 = vsel %vm1828_vm9, %v1825_v37, %v1371_v19  ;;  %v4328_v57 = vld [vmem:[#allocation57_spill] sm:$0xff] }
 0x28a   : > { %v991_v11 = vpop.permute.xlu0 %990 }
 0x28b   : > { %v989_v8 = vpop.permute.xlu1 %988 }
 0x28c   : > { %v1760_v17 = vsel %vm1729_vm5, %v1727_v24, %v989_v8 }
 0x28e   : > { %v1499_v2 = vpop.permute.xlu0 %1498 }
 0x28f   : > { %v1497_v49 = vpop.permute.xlu1 %1496  ;;  %v1891_v32 = vsel %vm1861_vm8, %v1858_v31, %v1499_v2 }
 0x290   : > { %v1890_v44 = vsel %vm1861_vm8, %v1857_v60, %v1497_v49 }
 0x292   : > { %v1119_v62 = vpop.permute.xlu0 %1118 }
 0x293   : > { %v1117_v42 = vpop.permute.xlu1 %1116 }
 0x294   : > { %v1793_v51 = vsel %vm1762_vm6, %v1760_v17, %v1117_v42 }
 0x295   : > { %v2658_v34 = vpop.f32.mrf.mxu0 }
 0x296   : > { %2445 = vst.msk [vmem:[%s2826_s25 + $0x58] sm:$0xff] %vm318_vm2, %v2658_v34  ;;  %v1627_v1 = vpop.permute.xlu0 %1626  ;;  %v2339_v63 = vmul.f32 %v2658_v34, %v2658_v34  ;;  %v2280_v33 = vsel %vm318_vm2, %v2658_v34, 0.0 }
 0x297   : > { %v1924_v47 = vsel %vm1894_vm10, %v1891_v32, %v1627_v1  ;;  %v1625_v50 = vpop.permute.xlu1 %1624  ;;  %v2149_v45 = vpop.f32.mrf.mxu0 }
 0x298   : > { %v1923_v58 = vsel %vm1894_vm10, %v1890_v44, %v1625_v50  ;;  %v2278_v29 = vsel %vm318_vm2, %v2149_v45, 0.0  ;;  %v2338_v4 = vmul.f32 %v2149_v45, %v2149_v45  ;;  %2444 = vst.msk [vmem:[%s2826_s25 + $0x50] sm:$0xff] %vm318_vm2, %v2149_v45  ;;  %v2381_v5 = vsel %vm318_vm2, %v2339_v63, 0.0 }
 0x299   : > { %v2279_v39 = vadd.f32 %v2278_v29, %v2277_v10  ;;  %2683 = vmatprep.mubr.msk.f32.mxu1 %vm1932_vm11, %v1923_v58  ;;  %v1695_v10 = vsel %vm318_vm2, %v382_v7, %v4327_v23 }
 0x29a   : > { %v2379_v15 = vsel %vm318_vm2, %v2338_v4, 0.0  ;;  %2684 = vmatmul.mubr.msk.f32.gmra.mxu1 %vm1932_vm11, %v1924_v47  ;;  %v1373_v25 = vpop.permute.xlu0 %1372 }
 0x29b   : > { %v2380_v35 = vadd.f32 %v2379_v15, %v2378_v26  ;;  %v1245_v12 = vpop.permute.xlu1 %1244  ;;  %v2281_v48 = vadd.f32 %v2280_v33, %v2279_v39  ;;  %v1728_v26 = vsel %vm1696_vm4, %v1695_v10, %v4328_v57 }
 0x29c   : > { %v1826_v41 = vsel %vm1795_vm7, %v1793_v51, %v1245_v12  ;;  %v1761_v3 = vsel %vm1729_vm5, %v1728_v26, %v991_v11 }
 0x29d   : > { %v2382_v20 = vadd.f32 %v2381_v5, %v2380_v35  ;;  %v1859_v53 = vsel %vm1828_vm9, %v1826_v41, %v1373_v25  ;;  %v1794_v43 = vsel %vm1762_vm6, %v1761_v3, %v1119_v62 }
 0x29e   : > { %v1501_v13 = vpop.permute.xlu0 %1500 }
 0x29f   : > { %v1247_v0 = vpop.permute.xlu1 %1246  ;;  %v1892_v61 = vsel %vm1861_vm8, %v1859_v53, %v1501_v13 }
 0x2a0   : > { %v1827_v16 = vsel %vm1795_vm7, %v1794_v43, %v1247_v0 }
 0x2a2   : > { %v1629_v46 = vpop.permute.xlu0 %1628 }
 0x2a3   : > { %v1925_v19 = vsel %vm1894_vm10, %v1892_v61, %v1629_v46  ;;  %v1375_v14 = vpop.permute.xlu1 %1374 }
 0x2a4   : > { %2686 = vmatprep.mubr.msk.f32.mxu1 %vm1932_vm11, %v1925_v19  ;;  %v1860_v2 = vsel %vm1828_vm9, %v1827_v16, %v1375_v14 }
 0x2a7   : > { %v1503_v8 = vpop.permute.xlu1 %1502 }
 0x2a8   : > { %v1893_v30 = vsel %vm1861_vm8, %v1860_v2, %v1503_v8 }
 0x2a9   : > { %v2661_v38 = vpop.f32.mrf.mxu0 }
 0x2aa   : > { %2447 = vst.msk [vmem:[%s2826_s25 + $0x68] sm:$0xff] %vm318_vm2, %v2661_v38  ;;  %v2341_v6 = vmul.f32 %v2661_v38, %v2661_v38  ;;  %v2284_v27 = vsel %vm318_vm2, %v2661_v38, 0.0 }
 0x2ab   : > { %v1631_v55 = vpop.permute.xlu1 %1630  ;;  %v2159_v40 = vpop.f32.mrf.mxu0 }
 0x2ac   : > { %v1926_v49 = vsel %vm1894_vm10, %v1893_v30, %v1631_v55  ;;  %v2282_v11 = vsel %vm318_vm2, %v2159_v40, 0.0  ;;  %v2340_v59 = vmul.f32 %v2159_v40, %v2159_v40  ;;  %2446 = vst.msk [vmem:[%s2826_s25 + $0x60] sm:$0xff] %vm318_vm2, %v2159_v40  ;;  %v2385_v37 = vsel %vm318_vm2, %v2341_v6, 0.0 }
 0x2ad   : > { %v2283_v36 = vadd.f32 %v2282_v11, %v2281_v48  ;;  %2687 = vmatmul.mubr.msk.f32.gmra.mxu1 %vm1932_vm11, %v1926_v49 }
 0x2ae   : > { %v2383_v54 = vsel %vm318_vm2, %v2340_v59, 0.0 }
 0x2af   : > { %v2384_v21 = vadd.f32 %v2383_v54, %v2382_v20  ;;  %v2285_v28 = vadd.f32 %v2284_v27, %v2283_v36 }
 0x2b1   : > { %v2386_v62 = vadd.f32 %v2385_v37, %v2384_v21 }
 0x2bd   : > { %v2664_v18 = vpop.f32.mrf.mxu0 }
 0x2be   : > { %2449 = vst.msk [vmem:[%s2826_s25 + $0x78] sm:$0xff] %vm318_vm2, %v2664_v18  ;;  %v2343_v31 = vmul.f32 %v2664_v18, %v2664_v18  ;;  %v2288_v1 = vsel %vm318_vm2, %v2664_v18, 0.0 }
 0x2bf   : > { %v2169_v42 = vpop.f32.mrf.mxu0 }
 0x2c0   : > { %v2286_v34 = vsel %vm318_vm2, %v2169_v42, 0.0  ;;  %v2342_v32 = vmul.f32 %v2169_v42, %v2169_v42  ;;  %2448 = vst.msk [vmem:[%s2826_s25 + $0x70] sm:$0xff] %vm318_vm2, %v2169_v42  ;;  %v2389_v50 = vsel %vm318_vm2, %v2343_v31, 0.0 }
 0x2c1   : > { %v2287_v60 = vadd.f32 %v2286_v34, %v2285_v28 }
 0x2c2   : > { %v2387_v52 = vsel %vm318_vm2, %v2342_v32, 0.0 }
 0x2c3   : > { %v2289_v44 = vadd.f32 %v2288_v1, %v2287_v60  ;;  %v2388_v47 = vadd.f32 %v2387_v52, %v2386_v62 }
 0x2c5   : > { %v2390_v45 = vadd.f32 %v2389_v50, %v2388_v47 }
 0x2d1   : > { %v2667_v63 = vpop.f32.mrf.mxu1 }
 0x2d2   : > { %2451 = vst.msk [vmem:[%s2826_s25 + $0x88] sm:$0xff] %vm318_vm2, %v2667_v63  ;;  %v2345_v29 = vmul.f32 %v2667_v63, %v2667_v63  ;;  %v2292_v9 = vsel %vm318_vm2, %v2667_v63, 0.0 }
 0x2d3   : > { %v2179_v58 = vpop.f32.mrf.mxu1 }
 0x2d4   : > { %v2290_v4 = vsel %vm318_vm2, %v2179_v58, 0.0  ;;  %v2344_v39 = vmul.f32 %v2179_v58, %v2179_v58  ;;  %2450 = vst.msk [vmem:[%s2826_s25 + $0x80] sm:$0xff] %vm318_vm2, %v2179_v58  ;;  %v2393_v22 = vsel %vm318_vm2, %v2345_v29, 0.0 }
 0x2d5   : > { %v2291_v56 = vadd.f32 %v2290_v4, %v2289_v44 }
 0x2d6   : > { %v2391_v33 = vsel %vm318_vm2, %v2344_v39, 0.0 }
 0x2d7   : > { %v2392_v15 = vadd.f32 %v2391_v33, %v2390_v45  ;;  %v2293_v25 = vadd.f32 %v2292_v9, %v2291_v56 }
 0x2d9   : > { %v2394_v24 = vadd.f32 %v2393_v22, %v2392_v15 }
 0x2e2   : > { %v2670_v35 = vpop.f32.mrf.mxu1 }
 0x2e3   : > { %2453 = vst.msk [vmem:[%s2826_s25 + $0x98] sm:$0xff] %vm318_vm2, %v2670_v35  ;;  %v2347_v48 = vmul.f32 %v2670_v35, %v2670_v35  ;;  %v2296_v20 = vsel %vm318_vm2, %v2670_v35, 0.0 }
 0x2e4   : > { %v2189_v12 = vpop.f32.mrf.mxu1 }
 0x2e5   : > { %v2294_v17 = vsel %vm318_vm2, %v2189_v12, 0.0  ;;  %v2346_v5 = vmul.f32 %v2189_v12, %v2189_v12  ;;  %2452 = vst.msk [vmem:[%s2826_s25 + $0x90] sm:$0xff] %vm318_vm2, %v2189_v12  ;;  %v2397_v53 = vsel %vm318_vm2, %v2347_v48, 0.0 }
 0x2e6   : > { %v2295_v51 = vadd.f32 %v2294_v17, %v2293_v25 }
 0x2e7   : > { %v2395_v41 = vsel %vm318_vm2, %v2346_v5, 0.0 }
 0x2e8   : > { %v2396_v13 = vadd.f32 %v2395_v41, %v2394_v24  ;;  %v2297_v0 = vadd.f32 %v2296_v20, %v2295_v51 }
 0x2ea   : > { %v2398_v7 = vadd.f32 %v2397_v53, %v2396_v13 }
 0x2fa   : > { %v2673_v61 = vpop.f32.mrf.mxu1 }
 0x2fb   : > { %2455 = vst.msk [vmem:[%s2826_s25 + $0xa8] sm:$0xff] %vm318_vm2, %v2673_v61  ;;  %v2349_v19 = vmul.f32 %v2673_v61, %v2673_v61  ;;  %v2300_v57 = vsel %vm318_vm2, %v2673_v61, 0.0 }
 0x2fc   : > { %v2199_v46 = vpop.f32.mrf.mxu1 }
 0x2fd   : > { %v2298_v14 = vsel %vm318_vm2, %v2199_v46, 0.0  ;;  %v2348_v23 = vmul.f32 %v2199_v46, %v2199_v46  ;;  %2454 = vst.msk [vmem:[%s2826_s25 + $0xa0] sm:$0xff] %vm318_vm2, %v2199_v46  ;;  %v2401_v43 = vsel %vm318_vm2, %v2349_v19, 0.0 }
 0x2fe   : > { %v2299_v10 = vadd.f32 %v2298_v14, %v2297_v0 }
 0x2ff   : > { %v2399_v26 = vsel %vm318_vm2, %v2348_v23, 0.0 }
 0x300   : > { %v2400_v3 = vadd.f32 %v2399_v26, %v2398_v7  ;;  %v2301_v8 = vadd.f32 %v2300_v57, %v2299_v10 }
 0x302   : > { %v2402_v16 = vadd.f32 %v2401_v43, %v2400_v3 }
 0x312   : > { %v2676_v38 = vpop.f32.mrf.mxu1 }
 0x313   : > { %2457 = vst.msk [vmem:[%s2826_s25 + $0xb8] sm:$0xff] %vm318_vm2, %v2676_v38  ;;  %v2351_v30 = vmul.f32 %v2676_v38, %v2676_v38  ;;  %v2304_v49 = vsel %vm318_vm2, %v2676_v38, 0.0 }
 0x314   : > { %v2209_v2 = vpop.f32.mrf.mxu1 }
 0x315   : > { %v2302_v55 = vsel %vm318_vm2, %v2209_v2, 0.0  ;;  %v2350_v40 = vmul.f32 %v2209_v2, %v2209_v2  ;;  %2456 = vst.msk [vmem:[%s2826_s25 + $0xb0] sm:$0xff] %vm318_vm2, %v2209_v2  ;;  %v2405_v27 = vsel %vm318_vm2, %v2351_v30, 0.0 }
 0x316   : > { %v2303_v6 = vadd.f32 %v2302_v55, %v2301_v8 }
 0x317   : > { %v2403_v11 = vsel %vm318_vm2, %v2350_v40, 0.0 }
 0x318   : > { %v2404_v59 = vadd.f32 %v2403_v11, %v2402_v16  ;;  %v2305_v36 = vadd.f32 %v2304_v49, %v2303_v6  ;;  %v2258_v49 = vld [vmem:[#allocation3] sm:$0x3] }
 0x31a   : > { %v2406_v54 = vadd.f32 %v2405_v27, %v2404_v59 }
 0x32a   : > { %v2679_v21 = vpop.f32.mrf.mxu1 }
 0x32b   : > { %2459 = vst.msk [vmem:[%s2826_s25 + $0xc8] sm:$0xff] %vm318_vm2, %v2679_v21  ;;  %v2353_v1 = vmul.f32 %v2679_v21, %v2679_v21  ;;  %v2308_v47 = vsel %vm318_vm2, %v2679_v21, 0.0 }
 0x32c   : > { %v2219_v28 = vpop.f32.mrf.mxu1 }
 0x32d   : > { %2458 = vst.msk [vmem:[%s2826_s25 + $0xc0] sm:$0xff] %vm318_vm2, %v2219_v28  ;;  %v2352_v18 = vmul.f32 %v2219_v28, %v2219_v28  ;;  %v2306_v31 = vsel %vm318_vm2, %v2219_v28, 0.0  ;;  %v2409_v63 = vsel %vm318_vm2, %v2353_v1, 0.0 }
 0x32e   : > { %v2307_v60 = vadd.f32 %v2306_v31, %v2305_v36 }
 0x32f   : > { %v2407_v32 = vsel %vm318_vm2, %v2352_v18, 0.0 }
 0x330   : > { %v2408_v44 = vadd.f32 %v2407_v32, %v2406_v54  ;;  %v2309_v45 = vadd.f32 %v2308_v47, %v2307_v60 }
 0x332   : > { %v2410_v4 = vadd.f32 %v2409_v63, %v2408_v44 }
 0x342   : > { %v2682_v37 = vpop.f32.mrf.mxu1 }
 0x343   : > { %2461 = vst.msk [vmem:[%s2826_s25 + $0xd8] sm:$0xff] %vm318_vm2, %v2682_v37  ;;  %v2355_v39 = vmul.f32 %v2682_v37, %v2682_v37  ;;  %v2312_v33 = vsel %vm318_vm2, %v2682_v37, 0.0 }
 0x344   : > { %v2229_v62 = vpop.f32.mrf.mxu1 }
 0x345   : > { %2460 = vst.msk [vmem:[%s2826_s25 + $0xd0] sm:$0xff] %vm318_vm2, %v2229_v62  ;;  %v2354_v52 = vmul.f32 %v2229_v62, %v2229_v62  ;;  %v2310_v50 = vsel %vm318_vm2, %v2229_v62, 0.0  ;;  %v2413_v22 = vsel %vm318_vm2, %v2355_v39, 0.0 }
 0x346   : > { %v2311_v29 = vadd.f32 %v2310_v50, %v2309_v45 }
 0x347   : > { %v2411_v58 = vsel %vm318_vm2, %v2354_v52, 0.0 }
 0x348   : > { %v2412_v9 = vadd.f32 %v2411_v58, %v2410_v4  ;;  %v2313_v25 = vadd.f32 %v2312_v33, %v2311_v29 }
 0x34a   : > { %v2414_v12 = vadd.f32 %v2413_v22, %v2412_v9 }
 0x35a   : > { %v2685_v42 = vpop.f32.mrf.mxu1 }
 0x35b   : > { %2463 = vst.msk [vmem:[%s2826_s25 + $0xe8] sm:$0xff] %vm318_vm2, %v2685_v42  ;;  %v2357_v48 = vmul.f32 %v2685_v42, %v2685_v42  ;;  %v2316_v51 = vsel %vm318_vm2, %v2685_v42, 0.0 }
 0x35c   : > { %v2239_v34 = vpop.f32.mrf.mxu1 }
 0x35d   : > { %2462 = vst.msk [vmem:[%s2826_s25 + $0xe0] sm:$0xff] %vm318_vm2, %v2239_v34  ;;  %v2356_v56 = vmul.f32 %v2239_v34, %v2239_v34  ;;  %v2314_v15 = vsel %vm318_vm2, %v2239_v34, 0.0  ;;  %v2417_v13 = vsel %vm318_vm2, %v2357_v48, 0.0 }
 0x35e   : > { %v2315_v35 = vadd.f32 %v2314_v15, %v2313_v25 }
 0x35f   : > { %v2415_v24 = vsel %vm318_vm2, %v2356_v56, 0.0 }
 0x360   : > { %v2416_v17 = vadd.f32 %v2415_v24, %v2414_v12  ;;  %v2317_v41 = vadd.f32 %v2316_v51, %v2315_v35 }
 0x362   : > { %v2418_v46 = vadd.f32 %v2417_v13, %v2416_v17 }
 0x36d   : > { %v2688_v5 = vpop.f32.mrf.mxu1 }
 0x36e   : > { %2465 = vst.msk [vmem:[%s2826_s25 + $0xf8] sm:$0xff] %vm318_vm2, %v2688_v5  ;;  %v2359_v0 = vmul.f32 %v2688_v5, %v2688_v5  ;;  %v2320_v19 = vsel %vm318_vm2, %v2688_v5, 0.0 }
 0x36f   : > { %v2249_v20 = vpop.f32.mrf.mxu1 }
 0x370   : > { %v2318_v53 = vsel %vm318_vm2, %v2249_v20, 0.0  ;;  %v2358_v7 = vmul.f32 %v2249_v20, %v2249_v20  ;;  %2464 = vst.msk [vmem:[%s2826_s25 + $0xf0] sm:$0xff] %vm318_vm2, %v2249_v20  ;;  %v2421_v57 = vsel %vm318_vm2, %v2359_v0, 0.0 }
 0x371   : > { %v2319_v61 = vadd.f32 %v2318_v53, %v2317_v41 }
 0x372   : > { %v2419_v14 = vsel %vm318_vm2, %v2358_v7, 0.0 }
 0x373   : > { %v2321_v23 = vadd.f32 %v2320_v19, %v2319_v61  ;;  %v2420_v10 = vadd.f32 %v2419_v14, %v2418_v46 }
 0x375   : > { %v2322_v26 = vrot.slane %v2321_v23, 4  ;;  %v2422_v3 = vadd.f32 %v2421_v57, %v2420_v10 }
 0x377   : > { %v2323_v8 = vadd.f32 %v2322_v26, %v2321_v23  ;;  %v2423_v43 = vrot.slane %v2422_v3, 4 }
 0x379   : > { %v2324_v16 = vrot.slane %v2323_v8, 2  ;;  %v2424_v38 = vadd.f32 %v2423_v43, %v2422_v3 }
 0x37b   : > { %v2325_v2 = vadd.f32 %v2324_v16, %v2323_v8  ;;  %v2425_v30 = vrot.slane %v2424_v38, 2 }
 0x37d   : > { %v2326_v55 = vrot.slane %v2325_v2, 1  ;;  %v2426_v40 = vadd.f32 %v2425_v30, %v2424_v38 }
 0x37f   : > { %v2427_v6 = vrot.slane %v2426_v40, 1  ;;  %v2327_v11 = vadd.f32 %v2326_v55, %v2325_v2 }
 0x381   : > { %v2428_v59 = vadd.f32 %v2427_v6, %v2426_v40 }
 0x383   : > { %v2430_v36 = vsel %vm2429_vm12, %v2327_v11, %v2428_v59 }
 0x384   : > { %v2431_v27 = vadd.f32 %v2430_v36, %v2258_v49 }
 0x386   : > { %2433 = vst.msk [vmem:[#allocation3] sm:$0x3] %vm2432_vm13, %v2431_v27 }
 0x387   : > { %2743 = shalt.err (!%p2740_p12)
}
 0x388   : > { %2700 = dma.vmem_to_hbm [thread:$0]  (%p2703_p5), %s2482_s20, 32, %s4203_s5, [#allocation4]  }
 0x389   : > { %2759 = dma.done.wait (%p2703_p5), [#allocation4], 32  }
 0x38a   : > { %2761 = vsyncadd (%p2703_p5), [#allocation4], 4294967264 }
 0x38b PF: > { %s17_s18 = sadd.s32 1, %s2764_s18  }
 0x38c   : > { %p14_p13 = scmp.ge.s32.totalorder %s17_s18, 4  }
 0x38e   :  { %16 = sbr.rel (!%p14_p13) target bundleno = 1 (0x1), region = 81 }
 0x393   :  { %2502 = vsyncpa [#allocation4], 1 }
 0x394   :  { %2504 = vsyncpa [#allocation4 + $0x1], 1 }

</bundles_post_ra>
